<compile_context>
chip_gen: v6e
topology: v6e:2x2x1
jax: 0.10.0
libtpu: 0.0.40
codegen_flags: <defaults>
</compile_context>

<pallas_src>
import jax
import jax.numpy as jnp
from jax.experimental import pallas as pl
from jax.experimental.pallas import tpu as pltpu

FEAT_PAD = 128                      # padded input / output feature width (lane-dense)
HIDDEN_DIMS = (128, 256, 256, 128)  # fc1..fc4 output widths (already 128-aligned)


def _mlp_kernel(x_ref,
                w1_ref, b1_ref,
                w2_ref, b2_ref,
                w3_ref, b3_ref,
                w4_ref, b4_ref,
                w5_ref, b5_ref,
                o_ref):
    # Each dot runs bf16 x bf16 on the MXU with f32 accumulation; bias-add and ReLU
    # are done in f32 on the VPU.
    def layer(h, w_ref, b_ref, relu):
        acc = jnp.dot(h.astype(jnp.bfloat16), w_ref[...],
                      preferred_element_type=jnp.float32)
        acc = acc + b_ref[...]
        return jnp.maximum(acc, 0.0) if relu else acc

    h = x_ref[...]                       # (TB, 128) bf16
    h = layer(h, w1_ref, b1_ref, True)   # (TB, 128) f32
    h = layer(h, w2_ref, b2_ref, True)   # (TB, 256)
    h = layer(h, w3_ref, b3_ref, True)   # (TB, 256)
    h = layer(h, w4_ref, b4_ref, True)   # (TB, 128)
    h = layer(h, w5_ref, b5_ref, False)  # (TB, 128)  (cols >= action_size are exact zeros)
    o_ref[...] = h.astype(o_ref.dtype)


def nn_forward(x, params, *, action_size, block_batch=128):
    """x: (B, state_size) float32. Returns (B, action_size) float32."""
    batch, feat = x.shape
    assert feat <= FEAT_PAD, "state_size must be <= 128 for this padding scheme"

    # Pad batch to a tile multiple and features to 128 lanes (zero feature padding
    # matches the zero rows padded into w1, so results are unchanged). Feed bf16:
    # the first matmul casts to bf16 anyway, so this is lossless w.r.t. the kernel
    # math and halves the per-tile activation DMA.
    num_tiles = pl.cdiv(batch, block_batch)
    padded_batch = num_tiles * block_batch
    x_p = (jnp.zeros((padded_batch, FEAT_PAD), jnp.float32)
           .at[:batch, :feat].set(x)
           .astype(jnp.bfloat16))

    args = (
        x_p,
        params["w1"], params["b1"],
        params["w2"], params["b2"],
        params["w3"], params["b3"],
        params["w4"], params["b4"],
        params["w5"], params["b5"],
    )

    act_spec = pl.BlockSpec((block_batch, FEAT_PAD), lambda i: (i, 0))
    out_spec = pl.BlockSpec((block_batch, FEAT_PAD), lambda i: (i, 0))

    def resident(arr):
        # Whole-array block, constant index map -> kept resident in VMEM across
        # grid steps (weights/biases are DMA'd once, not per batch tile).
        return pl.BlockSpec(arr.shape, lambda i: (0, 0))

    in_specs = [act_spec] + [resident(a) for a in args[1:]]

    # Advisory cost estimate so XLA schedules this small custom call well.
    layer_flops = (FEAT_PAD * 128 + 128 * 256 + 256 * 256 + 256 * 128 + 128 * FEAT_PAD)
    flops = 2 * padded_batch * layer_flops
    bytes_accessed = int(
        sum(a.size * a.dtype.itemsize for a in args)
        + padded_batch * FEAT_PAD * 4  # f32 output
    )
    cost = pl.CostEstimate(flops=flops, transcendentals=0,
                           bytes_accessed=bytes_accessed)

    out = pl.pallas_call(
        _mlp_kernel,
        out_shape=jax.ShapeDtypeStruct((padded_batch, FEAT_PAD), jnp.float32),
        grid_spec=pltpu.PrefetchScalarGridSpec(
            num_scalar_prefetch=0,
            grid=(num_tiles,),
            in_specs=in_specs,
            out_specs=out_spec,
        ),
        compiler_params=pltpu.CompilerParams(
            dimension_semantics=("parallel",),
        ),
        cost_estimate=cost,
    )(*args)

    return out[:batch, :action_size]


def init_params(key, state_size, action_size, weight_dtype=jnp.bfloat16):
    """nn.Linear-style U(-1/sqrt(fan_in), 1/sqrt(fan_in)) init, pre-padded to
    (8,128)-aligned shapes. Weights in bf16 (halved DMA, bf16 MXU path); biases f32."""
    real_dims = [(state_size, 128), (128, 256), (256, 256), (256, 128), (128, action_size)]
    pad_dims = [(FEAT_PAD, 128), (128, 256), (256, 256), (256, 128), (128, FEAT_PAD)]
    params = {}
    for i, ((fi, fo), (pi, po)) in enumerate(zip(real_dims, pad_dims), start=1):
        key, kw, kb = jax.random.split(key, 3)
        bound = 1.0 / float(fi) ** 0.5
        w = jax.random.uniform(kw, (fi, fo), jnp.float32, minval=-bound, maxval=bound)
        b = jax.random.uniform(kb, (fo,), jnp.float32, minval=-bound, maxval=bound)
        w_p = jnp.zeros((pi, po), jnp.float32).at[:fi, :fo].set(w)
        b_p = jnp.zeros((1, po), jnp.float32).at[0, :fo].set(b)
        params[f"w{i}"] = w_p.astype(weight_dtype)
        params[f"b{i}"] = b_p
    return params


def _reference_forward(x, params, action_size):
    """Pure-JAX mirror of the kernel math (bf16 inputs/weights, f32 accumulate)."""
    batch, feat = x.shape
    h = (jnp.zeros((batch, FEAT_PAD), jnp.float32)
         .at[:, :feat].set(x)
         .astype(jnp.bfloat16))

    def layer(h, w, b, relu):
        acc = jnp.dot(h.astype(jnp.bfloat16), w,
                      preferred_element_type=jnp.float32) + b
        return jnp.maximum(acc, 0.0) if relu else acc

    h = layer(h, params["w1"], params["b1"], True)
    h = layer(h, params["w2"], params["b2"], True)
    h = layer(h, params["w3"], params["b3"], True)
    h = layer(h, params["w4"], params["b4"], True)
    h = layer(h, params["w5"], params["b5"], False)
    return h[:, :action_size]


if __name__ == "__main__":
    state_size = 10    # e.g. window_size used by the trading agent
    action_size = 3    # hold / buy / sell
    batch = 160        # non-multiple of 128 -> exercises batch padding, 2 grid tiles

    key = jax.random.PRNGKey(0)
    key, kx = jax.random.split(key)
    x = jax.random.normal(kx, (batch, state_size), dtype=jnp.float32)
    params = init_params(key, state_size, action_size)

    out = nn_forward(x, params, action_size=action_size)
    out = jax.block_until_ready(out)

    ref = _reference_forward(x, params, action_size)
    assert out.shape == (batch, action_size), out.shape
    assert jnp.allclose(out, ref, atol=1e-2, rtol=1e-2), \
        float(jnp.max(jnp.abs(out - ref)))

    print("KERNEL_OK")
</pallas_src>

<mosaic_0001>
module attributes {stable_mosaic.version = 11 : i64} {
  func.func @_mlp_kernel(%arg0: i32, %arg1: memref<128x128xbf16, #tpu.memory_space<vmem>>, %arg2: memref<128x128xbf16, #tpu.memory_space<vmem>>, %arg3: memref<1x128xf32, #tpu.memory_space<vmem>>, %arg4: memref<128x256xbf16, #tpu.memory_space<vmem>>, %arg5: memref<1x256xf32, #tpu.memory_space<vmem>>, %arg6: memref<256x256xbf16, #tpu.memory_space<vmem>>, %arg7: memref<1x256xf32, #tpu.memory_space<vmem>>, %arg8: memref<256x128xbf16, #tpu.memory_space<vmem>>, %arg9: memref<1x128xf32, #tpu.memory_space<vmem>>, %arg10: memref<128x128xbf16, #tpu.memory_space<vmem>>, %arg11: memref<1x128xf32, #tpu.memory_space<vmem>>, %arg12: memref<128x128xf32, #tpu.memory_space<vmem>>) attributes {dimension_semantics = [#tpu.dimension_semantics<parallel>], iteration_bounds = array<i64: 2>, scalar_prefetch = 0 : i64, scratch_operands = 0 : i64, tpu.core_type = #tpu.core_type<tc>, window_params = [{transform_indices = @transform_0, window_bounds = array<i64: 128, 128>}, {pipeline_mode = #tpu.pipeline_mode<synchronous>, transform_indices = @transform_1, window_bounds = array<i64: 128, 128>}, {pipeline_mode = #tpu.pipeline_mode<synchronous>, transform_indices = @transform_2, window_bounds = array<i64: 1, 128>}, {pipeline_mode = #tpu.pipeline_mode<synchronous>, transform_indices = @transform_3, window_bounds = array<i64: 128, 256>}, {pipeline_mode = #tpu.pipeline_mode<synchronous>, transform_indices = @transform_4, window_bounds = array<i64: 1, 256>}, {pipeline_mode = #tpu.pipeline_mode<synchronous>, transform_indices = @transform_5, window_bounds = array<i64: 256, 256>}, {pipeline_mode = #tpu.pipeline_mode<synchronous>, transform_indices = @transform_6, window_bounds = array<i64: 1, 256>}, {pipeline_mode = #tpu.pipeline_mode<synchronous>, transform_indices = @transform_7, window_bounds = array<i64: 256, 128>}, {pipeline_mode = #tpu.pipeline_mode<synchronous>, transform_indices = @transform_8, window_bounds = array<i64: 1, 128>}, {pipeline_mode = #tpu.pipeline_mode<synchronous>, transform_indices = @transform_9, window_bounds = array<i64: 128, 128>}, {pipeline_mode = #tpu.pipeline_mode<synchronous>, transform_indices = @transform_10, window_bounds = array<i64: 1, 128>}, {transform_indices = @transform_11, window_bounds = array<i64: 128, 128>}]} {
    %c0 = arith.constant 0 : index
    %c0_0 = arith.constant 0 : index
    %0 = vector.load %arg1[%c0, %c0_0] : memref<128x128xbf16, #tpu.memory_space<vmem>>, vector<128x128xbf16>
    %c0_1 = arith.constant 0 : index
    %c0_2 = arith.constant 0 : index
    %1 = vector.load %arg2[%c0_1, %c0_2] : memref<128x128xbf16, #tpu.memory_space<vmem>>, vector<128x128xbf16>
    %cst = arith.constant dense<0.000000e+00> : vector<128x128xf32>
    %2 = tpu.matmul %0, %1, %cst {dimension_numbers = #tpu.dot_dimension_numbers<[1], [0], [0], [1], [0, 0, 1, 1], [], []>} : vector<128x128xbf16>, vector<128x128xbf16>, vector<128x128xf32> -> vector<128x128xf32>
    %c0_3 = arith.constant 0 : index
    %c0_4 = arith.constant 0 : index
    %3 = vector.load %arg3[%c0_3, %c0_4] : memref<1x128xf32, #tpu.memory_space<vmem>>, vector<1x128xf32>
    %4 = vector.broadcast %3 : vector<1x128xf32> to vector<128x128xf32>
    %5 = arith.addf %2, %4 : vector<128x128xf32>
    %cst_5 = arith.constant 0.000000e+00 : f32
    %6 = vector.broadcast %cst_5 : f32 to vector<128x128xf32>
    %7 = arith.maximumf %5, %6 : vector<128x128xf32>
    %8 = arith.truncf %7 : vector<128x128xf32> to vector<128x128xbf16>
    %c0_6 = arith.constant 0 : index
    %c0_7 = arith.constant 0 : index
    %9 = vector.load %arg4[%c0_6, %c0_7] : memref<128x256xbf16, #tpu.memory_space<vmem>>, vector<128x256xbf16>
    %cst_8 = arith.constant dense<0.000000e+00> : vector<128x256xf32>
    %10 = tpu.matmul %8, %9, %cst_8 {dimension_numbers = #tpu.dot_dimension_numbers<[1], [0], [0], [1], [0, 0, 1, 1], [], []>} : vector<128x128xbf16>, vector<128x256xbf16>, vector<128x256xf32> -> vector<128x256xf32>
    %c0_9 = arith.constant 0 : index
    %c0_10 = arith.constant 0 : index
    %11 = vector.load %arg5[%c0_9, %c0_10] : memref<1x256xf32, #tpu.memory_space<vmem>>, vector<1x256xf32>
    %12 = vector.broadcast %11 : vector<1x256xf32> to vector<128x256xf32>
    %13 = arith.addf %10, %12 : vector<128x256xf32>
    %cst_11 = arith.constant 0.000000e+00 : f32
    %14 = vector.broadcast %cst_11 : f32 to vector<128x256xf32>
    %15 = arith.maximumf %13, %14 : vector<128x256xf32>
    %16 = arith.truncf %15 : vector<128x256xf32> to vector<128x256xbf16>
    %c0_12 = arith.constant 0 : index
    %c0_13 = arith.constant 0 : index
    %17 = vector.load %arg6[%c0_12, %c0_13] : memref<256x256xbf16, #tpu.memory_space<vmem>>, vector<256x256xbf16>
    %cst_14 = arith.constant dense<0.000000e+00> : vector<128x256xf32>
    %18 = tpu.matmul %16, %17, %cst_14 {dimension_numbers = #tpu.dot_dimension_numbers<[1], [0], [0], [1], [0, 0, 1, 1], [], []>} : vector<128x256xbf16>, vector<256x256xbf16>, vector<128x256xf32> -> vector<128x256xf32>
    %c0_15 = arith.constant 0 : index
    %c0_16 = arith.constant 0 : index
    %19 = vector.load %arg7[%c0_15, %c0_16] : memref<1x256xf32, #tpu.memory_space<vmem>>, vector<1x256xf32>
    %20 = vector.broadcast %19 : vector<1x256xf32> to vector<128x256xf32>
    %21 = arith.addf %18, %20 : vector<128x256xf32>
    %cst_17 = arith.constant 0.000000e+00 : f32
    %22 = vector.broadcast %cst_17 : f32 to vector<128x256xf32>
    %23 = arith.maximumf %21, %22 : vector<128x256xf32>
    %24 = arith.truncf %23 : vector<128x256xf32> to vector<128x256xbf16>
    %c0_18 = arith.constant 0 : index
    %c0_19 = arith.constant 0 : index
    %25 = vector.load %arg8[%c0_18, %c0_19] : memref<256x128xbf16, #tpu.memory_space<vmem>>, vector<256x128xbf16>
    %cst_20 = arith.constant dense<0.000000e+00> : vector<128x128xf32>
    %26 = tpu.matmul %24, %25, %cst_20 {dimension_numbers = #tpu.dot_dimension_numbers<[1], [0], [0], [1], [0, 0, 1, 1], [], []>} : vector<128x256xbf16>, vector<256x128xbf16>, vector<128x128xf32> -> vector<128x128xf32>
    %c0_21 = arith.constant 0 : index
    %c0_22 = arith.constant 0 : index
    %27 = vector.load %arg9[%c0_21, %c0_22] : memref<1x128xf32, #tpu.memory_space<vmem>>, vector<1x128xf32>
    %28 = vector.broadcast %27 : vector<1x128xf32> to vector<128x128xf32>
    %29 = arith.addf %26, %28 : vector<128x128xf32>
    %cst_23 = arith.constant 0.000000e+00 : f32
    %30 = vector.broadcast %cst_23 : f32 to vector<128x128xf32>
    %31 = arith.maximumf %29, %30 : vector<128x128xf32>
    %32 = arith.truncf %31 : vector<128x128xf32> to vector<128x128xbf16>
    %c0_24 = arith.constant 0 : index
    %c0_25 = arith.constant 0 : index
    %33 = vector.load %arg10[%c0_24, %c0_25] : memref<128x128xbf16, #tpu.memory_space<vmem>>, vector<128x128xbf16>
    %cst_26 = arith.constant dense<0.000000e+00> : vector<128x128xf32>
    %34 = tpu.matmul %32, %33, %cst_26 {dimension_numbers = #tpu.dot_dimension_numbers<[1], [0], [0], [1], [0, 0, 1, 1], [], []>} : vector<128x128xbf16>, vector<128x128xbf16>, vector<128x128xf32> -> vector<128x128xf32>
    %c0_27 = arith.constant 0 : index
    %c0_28 = arith.constant 0 : index
    %35 = vector.load %arg11[%c0_27, %c0_28] : memref<1x128xf32, #tpu.memory_space<vmem>>, vector<1x128xf32>
    %36 = vector.broadcast %35 : vector<1x128xf32> to vector<128x128xf32>
    %37 = arith.addf %34, %36 : vector<128x128xf32>
    %c0_29 = arith.constant 0 : index
    %c0_30 = arith.constant 0 : index
    %38 = vector.load %arg12[%c0_29, %c0_30] : memref<128x128xf32, #tpu.memory_space<vmem>>, vector<128x128xf32>
    tpu.vector_store %arg12[%c0_29, %c0_30], %37 {strides = array<i32>} : memref<128x128xf32, #tpu.memory_space<vmem>>, vector<128x128xf32>,
    return
  }
  func.func @transform_0(%arg0: i32) -> (i32, i32) {
    %c0_i32 = arith.constant 0 : i32
    %c0_i32_0 = arith.constant 0 : i32
    return %arg0, %c0_i32 : i32, i32
  }
  func.func @transform_1(%arg0: i32) -> (i32, i32) {
    %c0_i32 = arith.constant 0 : i32
    %c0_i32_0 = arith.constant 0 : i32
    %c0_i32_1 = arith.constant 0 : i32
    return %c0_i32, %c0_i32_0 : i32, i32
  }
  func.func @transform_2(%arg0: i32) -> (i32, i32) {
    %c0_i32 = arith.constant 0 : i32
    %c0_i32_0 = arith.constant 0 : i32
    %c0_i32_1 = arith.constant 0 : i32
    return %c0_i32, %c0_i32_0 : i32, i32
  }
  func.func @transform_3(%arg0: i32) -> (i32, i32) {
    %c0_i32 = arith.constant 0 : i32
    %c0_i32_0 = arith.constant 0 : i32
    %c0_i32_1 = arith.constant 0 : i32
    return %c0_i32, %c0_i32_0 : i32, i32
  }
  func.func @transform_4(%arg0: i32) -> (i32, i32) {
    %c0_i32 = arith.constant 0 : i32
    %c0_i32_0 = arith.constant 0 : i32
    %c0_i32_1 = arith.constant 0 : i32
    return %c0_i32, %c0_i32_0 : i32, i32
  }
  func.func @transform_5(%arg0: i32) -> (i32, i32) {
    %c0_i32 = arith.constant 0 : i32
    %c0_i32_0 = arith.constant 0 : i32
    %c0_i32_1 = arith.constant 0 : i32
    return %c0_i32, %c0_i32_0 : i32, i32
  }
  func.func @transform_6(%arg0: i32) -> (i32, i32) {
    %c0_i32 = arith.constant 0 : i32
    %c0_i32_0 = arith.constant 0 : i32
    %c0_i32_1 = arith.constant 0 : i32
    return %c0_i32, %c0_i32_0 : i32, i32
  }
  func.func @transform_7(%arg0: i32) -> (i32, i32) {
    %c0_i32 = arith.constant 0 : i32
    %c0_i32_0 = arith.constant 0 : i32
    %c0_i32_1 = arith.constant 0 : i32
    return %c0_i32, %c0_i32_0 : i32, i32
  }
  func.func @transform_8(%arg0: i32) -> (i32, i32) {
    %c0_i32 = arith.constant 0 : i32
    %c0_i32_0 = arith.constant 0 : i32
    %c0_i32_1 = arith.constant 0 : i32
    return %c0_i32, %c0_i32_0 : i32, i32
  }
  func.func @transform_9(%arg0: i32) -> (i32, i32) {
    %c0_i32 = arith.constant 0 : i32
    %c0_i32_0 = arith.constant 0 : i32
    %c0_i32_1 = arith.constant 0 : i32
    return %c0_i32, %c0_i32_0 : i32, i32
  }
  func.func @transform_10(%arg0: i32) -> (i32, i32) {
    %c0_i32 = arith.constant 0 : i32
    %c0_i32_0 = arith.constant 0 : i32
    %c0_i32_1 = arith.constant 0 : i32
    return %c0_i32, %c0_i32_0 : i32, i32
  }
  func.func @transform_11(%arg0: i32) -> (i32, i32) {
    %c0_i32 = arith.constant 0 : i32
    %c0_i32_0 = arith.constant 0 : i32
    return %arg0, %c0_i32 : i32, i32
  }
}

</mosaic_0001>

<bundles_post_ra>
// kernel: tpu_custom_call.1
= control target key start
LH: loop header
LB: loop body
LE: loop exit
PB: predicated region body
PF: predicated region fallthrough
CT: control target
= control target key end

     0   :  { %s3159_s0 = inlined_call_operand.hbm [shape: bf16[256,128], index: 0, kind: input, shape index: {}]   ;;  %s3160_s1 = inlined_call_operand.hbm [shape: bf16[128,128], index: 1, kind: input, shape index: {}]   ;;  %s3161_s2 = inlined_call_operand.vmem [shape: f32[1,128], index: 2, kind: input, shape index: {}]   ;;  %s3162_s3 = inlined_call_operand.hbm [shape: bf16[128,256], index: 3, kind: input, shape index: {}]   ;;  %s3163_s4 = inlined_call_operand.vmem [shape: f32[1,256], index: 4, kind: input, shape index: {}]   ;;  %s3164_s5 = inlined_call_operand.hbm [shape: bf16[256,256], index: 5, kind: input, shape index: {}]   ;;  %s3165_s6 = inlined_call_operand.vmem [shape: f32[1,256], index: 6, kind: input, shape index: {}]   ;;  %s3166_s7 = inlined_call_operand.hbm [shape: bf16[256,128], index: 7, kind: input, shape index: {}]   ;;  %s3167_s8 = inlined_call_operand.vmem [shape: f32[1,128], index: 8, kind: input, shape index: {}]   ;;  %s3168_s9 = inlined_call_operand.hbm [shape: bf16[128,128], index: 9, kind: input, shape index: {}]   ;;  %s3169_s10 = inlined_call_operand.vmem [shape: f32[1,128], index: 10, kind: input, shape index: {}]   ;;  %s3170_s11 = inlined_call_operand.hbm [shape: f32[256,128], index: 11, kind: output, shape index: {}]  }
   0x1   :  { %3180 = sst [smem:[#allocation21_spill]] %s3160_s1 }
   0x2   :  { %3181 = sst [smem:[#allocation22_spill]] %s3162_s3 }
   0x3   :  { %3182 = sst [smem:[#allocation23_spill]] %s3164_s5 }
   0x4   :  { %3183 = sst [smem:[#allocation24_spill]] %s3166_s7 }
   0x5   :  { %3184 = sst [smem:[#allocation25_spill]] %s3168_s9 }
   0x6   :  { %16 = vsyncpa [#allocation3], 0 }
   0x7   :  { %18 = vsyncpa [#allocation3 + $0x1], 0 }
   0x8   :  { %19 = vsyncpa [#allocation6], 0 }
   0x9   :  { %20 = vsyncpa [#allocation9], 0 }
   0xa   :  { %21 = vsyncpa [#allocation12], 0 }
   0xb   :  { %22 = vsyncpa [#allocation4], 0 }
   0xc   :  { %24 = vsyncpa [#allocation4 + $0x1], 0  ;;  %s2765_s17 = smov 0   ;;  %s2767_s18 = smov 0  }
   0xd   :  { %s2769_s19 = smov 0   ;;  %s2771_s20 = smov 0  }
   0xe LB: > { %3185 = sst [smem:[#allocation19_spill]] %s2685_s19  ;;  %s2691_s21 = smov [#allocation5]   ;;  %s2689_s20 = sphi %s2771_s20, %s3216_s20   ;;  %s2685_s19 = sphi %s2769_s19, %s3213_s19   ;;  %s2681_s18 = sphi %s2767_s18, %s3215_s18   ;;  %s2677_s17 = sphi %s2765_s17, %s3214_s17  }
   0xf   : > { %s309_s22 = sshll.u32 %s2691_s21, 4  ;;  %s2786_s23 = sadd.s32 4294967295, %s2689_s20   ;;  %s310_s22 = int_to_ptr.vmem [resolvable:$true] %s309_s22 }
  0x10   : > { %p1947_p0 = scmp.ge.s32.totalorder %s2689_s20, 1  ;;  %p3175_p1 = scmp.eq.s32.totalorder %s2786_s23, 0 }
  0x11   : > { %p297_p2 = scmp.lt.s32.totalorder %s2689_s20, 3  ;;  %s2692_s26 = smov [#allocation8]  }
  0x12   : > { %s341_s27 = sshll.u32 %s2692_s26, 4  ;;  %s2693_s28 = smov [#allocation7]   ;;  %s2804_s27 = int_to_ptr.vmem [resolvable:$true] %s341_s27 }
  0x13   : > { %p2791_p3 = pnand %p1947_p0, %p297_p2  ;;  %s2806_s29 = sshll.u32 %s2693_s28, 4  ;;  %s326_s29 = int_to_ptr.vmem [resolvable:$true] %s2806_s29 }
  0x14   : > { %s2466_s12 = scalar_lea.vmem %s310_s22, 1024  ;;  %p2474_p11 = scmp.lt.s32.totalorder %s310_s22, %s310_s22 }
  0x15   : > { %s3186_s24 = scalar_select %p2791_p3, 1, 0 }
  0x16   : > { %p2263_p5 = pneg %p2791_p3  ;;  %p2467_p8 = scmp.ne.s32.totalorder %s310_s22, %s2466_s12 }
  0x17   : > { %p2475_p12 = scmp.lt.s32.totalorder %s2466_s12, %s2466_s12 }
  0x18   : > { %p2800_p6 = pnand %p2263_p5, %p3175_p1 }
  0x19   : > { %p2476_p13 = por %p2475_p12, %p2474_p11 }
  0x1a   : > { %p2810_p7 = pneg %p2800_p6 }
  0x1c   : > { %p2469_p9 = pnand %p2467_p8, %p2810_p7 }
  0x1e   : > { %p2470_p10 = pneg %p2469_p9 }
  0x20   : > { %p2477_p0 = pnand %p2476_p13, %p2470_p10 }
  0x22   : > { %2480 = shalt.err (!%p2477_p0)
}
  0x23   : > { %s3171_s13 = smov 64   ;;  %s3173_s14 = smov 4  }
  0x24   : > { %s3189_s1 = sld [smem:[#allocation21_spill]]  ;;  %s2492_s21 = scalar_lea.vmem %s2804_s27, 4096 }
  0x25   : > { %p2493_p2 = scmp.ne.s32.totalorder %s2804_s27, %s2492_s21  ;;  %p2500_p9 = scmp.lt.s32.totalorder %s2804_s27, %s2804_s27 }
  0x26   : > { %p2501_p10 = scmp.lt.s32.totalorder %s2492_s21, %s2492_s21 }
  0x27   : > { %p2495_p5 = pnand %p2493_p2, %p2810_p7 }
  0x28   : > { %p2502_p11 = por %p2501_p10, %p2500_p9 }
  0x29   : > { %p2496_p8 = pneg %p2495_p5 }
  0x2a   : > { %2266 = dma.hbm_to_vmem [thread:$0]  (!%p2800_p6), %s3189_s1, 1024, %s310_s22, [#allocation6], %s3171_s13, %s3171_s13, %s3173_s14  }
  0x2b   : > { %p2503_p12 = pnand %p2502_p11, %p2496_p8 }
  0x2d   : > { %2506 = shalt.err (!%p2503_p12)
}
  0x2e   : > { %s2696_s26 = smov 128   ;;  %s2697_s28 = smov 8  }
  0x2f   : > { %s3190_s5 = sld [smem:[#allocation23_spill]]  ;;  %s2518_s15 = scalar_lea.vmem %s326_s29, 2048 }
  0x30   : > { %p2519_p13 = scmp.ne.s32.totalorder %s326_s29, %s2518_s15  ;;  %p2526_p5 = scmp.lt.s32.totalorder %s326_s29, %s326_s29 }
  0x31   : > { %p2527_p8 = scmp.lt.s32.totalorder %s2518_s15, %s2518_s15 }
  0x32   : > { %p2521_p0 = pnand %p2519_p13, %p2810_p7 }
  0x33   : > { %p2528_p9 = por %p2527_p8, %p2526_p5 }
  0x34   : > { %p2522_p2 = pneg %p2521_p0 }
  0x35   : > { %2272 = dma.hbm_to_vmem [thread:$0]  (!%p2800_p6), %s3190_s5, 4096, %s2804_s27, [#allocation9], %s2696_s26, %s2696_s26, %s2697_s28  }
  0x36   : > { %p2529_p10 = pnand %p2528_p9, %p2522_p2 }
  0x38   : > { %2532 = shalt.err (!%p2529_p10)
}
  0x39   : > { %s3191_s3 = sld [smem:[#allocation22_spill]]  ;;  %s2698_s12 = smov [#allocation10]  }
  0x3a   : > { %s357_s27 = sshll.u32 %s2698_s12, 4  ;;  %s2699_s22 = smov [#allocation11]   ;;  %s358_s27 = int_to_ptr.vmem [resolvable:$true] %s357_s27 }
  0x3b   : > { %s373_s13 = sshll.u32 %s2699_s22, 4  ;;  %s2544_s14 = scalar_lea.vmem %s358_s27, 2048  ;;  %s374_s13 = int_to_ptr.vmem [resolvable:$true] %s373_s13 }
  0x3c   : > { %p2545_p11 = scmp.ne.s32.totalorder %s358_s27, %s2544_s14  ;;  %p2552_p0 = scmp.lt.s32.totalorder %s358_s27, %s358_s27 }
  0x3d   : > { %p2553_p2 = scmp.lt.s32.totalorder %s2544_s14, %s2544_s14 }
  0x3e   : > { %p2547_p12 = pnand %p2545_p11, %p2810_p7 }
  0x3f   : > { %2269 = dma.hbm_to_vmem [thread:$0]  (!%p2800_p6), %s3191_s3, 2048, %s326_s29, [#allocation6], %s2696_s26, %s2696_s26, %s2697_s28  }
  0x40   : > { %p2548_p13 = pneg %p2547_p12  ;;  %p2554_p5 = por %p2553_p2, %p2552_p0 }
  0x42   : > { %p2555_p8 = pnand %p2554_p5, %p2548_p13 }
  0x44   : > { %2558 = shalt.err (!%p2555_p8)
}
  0x45   : > { %s3192_s15 = smov 4   ;;  %s3193_s16 = smov 64  }
  0x46   : > { %s3194_s7 = sld [smem:[#allocation24_spill]]  ;;  %s2570_s28 = scalar_lea.vmem %s374_s13, 1024 }
  0x47   : > { %p2571_p9 = scmp.ne.s32.totalorder %s374_s13, %s2570_s28  ;;  %p2578_p12 = scmp.lt.s32.totalorder %s374_s13, %s374_s13 }
  0x48   : > { %p2579_p0 = scmp.lt.s32.totalorder %s2570_s28, %s2570_s28 }
  0x49   : > { %p2573_p10 = pnand %p2571_p9, %p2810_p7 }
  0x4a   : > { %p2580_p13 = por %p2579_p0, %p2578_p12 }
  0x4b   : > { %p2574_p11 = pneg %p2573_p10 }
  0x4c   : > { %2275 = dma.hbm_to_vmem [thread:$0]  (!%p2800_p6), %s3194_s7, 2048, %s358_s27, [#allocation9], %s3193_s16, %s3193_s16, %s3192_s15  }
  0x4d   : > { %p2581_p2 = pnand %p2580_p13, %p2574_p11 }
  0x4f   : > { %2584 = shalt.err (!%p2581_p2)
}
  0x50   : > { %s3195_s9 = sld [smem:[#allocation25_spill]]  ;;  %s1946_s25 = sadd.s32 4294967294, %s2689_s20  }
  0x51   : > { %s2866_s30 = sadd.s32 1, %s2689_s20   ;;  %s37_s12 = sadd.s32 1, %s2685_s19 }
  0x52   : > { %s34_s27 = ssub.s32 %s2689_s20, %s2866_s30  ;;  %p44_p7 = scmp.ne.s32.totalorder %s2685_s19, %s2681_s18 }
  0x53   : > { %p35_p5 = scmp.eq.s32.totalorder %s34_s27, 0  ;;  %p45_p8 = scmp.eq.s32.totalorder %s2689_s20, 0 }
  0x54   : > { %p50_p9 = scmp.ne.s32.totalorder %s2681_s18, %s2677_s17  ;;  %p284_p10 = scmp.eq.s32.totalorder %s2786_s23, 1 }
  0x55   : > { %s2878_s22 = scalar_select %p35_p5, %s2685_s19, %s37_s12  }
  0x56   : > { %2278 = dma.hbm_to_vmem [thread:$0]  (!%p2800_p6), %s3195_s9, 1024, %s374_s13, [#allocation12], %s3193_s16, %s3193_s16, %s3192_s15  }
  0x57   : > { %3196 = sst [smem:[#allocation20_spill]] %s2878_s22  ;;  %p46_p11 = por %p45_p8, %p44_p7 }
  0x58   : > { %p2882_p12 = por %p3175_p1, %p50_p9  ;;  %p2886_p6 = por %p284_p10, %p44_p7 }
  0x59   : > { %p290_p0 = scmp.eq.s32.totalorder %s1946_s25, 1  ;;  %p2292_p13 = scmp.lt.s32.totalorder %s2689_s20, 2 }
  0x5a   : > { %s3197_s29 = scalar_select %p2882_p12, 1, 0 }
  0x5b   : > { %s3198_s13 = scalar_select %p2886_p6, 1, 0 }
  0x5c   : > { %s390_s26 = sand.u32 1, %s2685_s19   ;;  %p2892_p2 = por %p290_p0, %p50_p9 }
  0x5d   : > { %s1954_s14 = sshll.u32 %s390_s26, 6  ;;  %s2061_s21 = sshll.u32 %s2689_s20, 10 }
  0x5e   : > { %s3199_s28 = scalar_select %p2892_p2, 1, 0 }
  0x5f   : > { %s2900_s1 = scalar_lea.hbm %s3159_s0, %s2061_s21  ;;  %s394_s3 = scalar_lea.vmem [#allocation2], %s1954_s14 }
  0x60   : > { %s401_s5 = sshll.u32 %s394_s3, 4  ;;  %p2902_p7 = pnand %p2292_p13, %p46_p11  ;;  %s2906_s5 = int_to_ptr.vmem [resolvable:$true] %s401_s5 }
  0x61   : > { %s2908_s7 = scalar_lea.sflag [#allocation3], %s390_s26  ;;  %s2585_s9 = scalar_lea.hbm %s2900_s1, 1024 }
  0x62   : > { %p2586_p5 = scmp.ne.s32.totalorder %s2900_s1, %s2585_s9  ;;  %p2587_p8 = pneg %p2902_p7 }
  0x63   : > { %s2590_s14 = scalar_lea.hbm %s3159_s0, 2048  ;;  %p2591_p11 = scmp.lt.s32.totalorder %s2900_s1, %s3159_s0 }
  0x64   : > { %p2588_p9 = pnand %p2587_p8, %p2586_p5  ;;  %p2592_p0 = scmp.lt.s32.totalorder %s2590_s14, %s2585_s9 }
  0x66   : > { %p2589_p10 = pneg %p2588_p9  ;;  %p2593_p13 = por %p2592_p0, %p2591_p11 }
  0x68   : > { %p2594_p4 = pnand %p2593_p13, %p2589_p10 }
  0x6a   : > { %2597 = shalt.err (!%p2594_p4)
}
  0x6b   : > { %s2598_s26 = scalar_lea.vmem %s2906_s5, 1024  ;;  %s2700_s22 = smov [#allocation2]  }
  0x6c   : > { %p2599_p1 = scmp.ne.s32.totalorder %s2906_s5, %s2598_s26  ;;  %s2603_s19 = sshll.u32 %s2700_s22, 4  ;;  %s2604_s19 = int_to_ptr.vmem [resolvable:$false] %s2603_s19 }
  0x6d   : > { %s2605_s21 = scalar_lea.vmem %s2604_s19, 2048  ;;  %p2606_p9 = scmp.lt.s32.totalorder %s2906_s5, %s2604_s19 }
  0x6e   : > { %p2601_p2 = pnand %p2599_p1, %p2587_p8  ;;  %p2607_p6 = scmp.lt.s32.totalorder %s2605_s21, %s2598_s26 }
  0x70   : > { %p2602_p5 = pneg %p2601_p2  ;;  %p2608_p12 = por %p2607_p6, %p2606_p9 }
  0x72   : > { %p2609_p3 = pnand %p2608_p12, %p2602_p5 }
  0x74   : > { %2612 = shalt.err (!%p2609_p3)
}
  0x75   : > { %2282 = dma.hbm_to_vmem [thread:$0]  (!%p2902_p7), %s2900_s1, 1024, %s2906_s5, %s2908_s7, %s3193_s16, %s3193_s16, %s3192_s15  }
  0x76   : > { %p3201_p1 = scmp.ne.s32.totalorder %s3186_s24, 0 }
  0x77   : > { %s2935_s9 = sand.u32 (!%p3201_p1), 1, %s2681_s18   ;;  %p3202_p3 = scmp.ne.s32.totalorder (!%p3201_p1), %s3197_s29, 0 }
  0x78   : > { %413 = sbr.rel (%p3201_p1) target bundleno = 1264 (0x4f0), region = 64  ;;  %s1958_s19 = sshll.u32 (!%p3201_p1), %s2935_s9, 6 }
  0x79   : > { %s416_s22 = scalar_lea.sflag (!%p3201_p1), [#allocation3], %s2935_s9  ;;  %s2939_s12 = scalar_lea.vmem (!%p3201_p1), [#allocation2], %s1958_s19 }
  0x7d   : > { %2656 = dma.done.wait (%p3202_p3), %s416_s22, 1024  }
  0x7e   : > { %2658 = vsyncadd (%p3202_p3), %s416_s22, 4294966272  ;;  %p3203_p4 = scmp.eq.s32.totalorder %s2786_s23, 0 }
  0x80   : > { %2660 = dma.done.wait (%p3203_p4), [#allocation6], 3072   ;;  %p3204_p12 = pmov %p3203_p4 }
  0x81   : > { %p3205_p6 = pmov %p3203_p4 }
  0x82   : > { %2662 = vsyncadd (%p3204_p12), [#allocation6], 4294964224 }
  0x83   : > { %2664 = dma.done.wait (%p3205_p6), [#allocation9], 6144   ;;  %p3206_p2 = pmov %p3203_p4 }
  0x85   : > { %2666 = vsyncadd (%p3206_p2), [#allocation9], 4294961152  ;;  %p3207_p7 = pmov %p3206_p2 }
  0x86   : > { %p3208_p8 = pmov %p3206_p2 }
  0x87   : > { %2668 = dma.done.wait (%p3207_p7), [#allocation12], 1024  }
  0x88   : > { %2670 = vsyncadd (%p3208_p8), [#allocation12], 4294966272  ;;  %v2343_v0 = vld [vmem:[#allocation5 + $0x38] sm:$0xff]   ;;  %v2344_v1 = vld [vmem:[#allocation5 + $0x30] sm:$0xff]   ;;  %v2701_v32 = vmov 0   ;;  %s1964_s14 = sshll.u32 %s2935_s9, 7 }
  0x89   : > { %2159 = vmatprep.subr.bf16.mxu0 %v2343_v0  ;;  %v2345_v2 = vld [vmem:[#allocation5 + $0x28] sm:$0xff]   ;;  %v2346_v3 = vld [vmem:[#allocation5 + $0x20] sm:$0xff]   ;;  %v2347_v5 = vld [vmem:[#allocation5 + $0x18] sm:$0xff]   ;;  %877 = vmatprep.mubr.bf16.mxu1 %v2701_v32  ;;  %s3091_s26 = scalar_lea.vmem [#allocation13], %s1964_s14  ;;  %s2062_s21 = sshll.u32 %s2786_s23, 11 }
  0x8a   : > { %2160 = vmatpush3.bf16.msra.mxu0 %v2343_v0  ;;  %v2351_v4 = vld [vmem:[%s2939_s12] sm:$0xff]   ;;  %v2348_v6 = vld [vmem:[#allocation5 + $0x10] sm:$0xff]   ;;  %v2349_v10 = vld [vmem:[#allocation5 + $0x8] sm:$0xff]   ;;  %s1825_s19 = sshll.u32 %s3091_s26, 4  ;;  %s3112_s1 = scalar_lea.hbm %s3170_s11, %s2062_s21  ;;  %s3114_s19 = int_to_ptr.vmem [resolvable:$true] %s1825_s19 }
  0x8b   : > { %2161 = vmatprep.subr.bf16.mxu0 %v2344_v1  ;;  %2175 = vmatprep.mubr.bf16.mxu0 %v2351_v4  ;;  %v2359_v7 = vld [vmem:[#allocation7 + $0x74] ss:$8 sps:$4 sm:$0xff]   ;;  %v2361_v8 = vld [vmem:[#allocation7 + $0x70] ss:$8 sps:$4 sm:$0xff]   ;;  %v2362_v9 = vld [vmem:[#allocation7 + $0x64] ss:$8 sps:$4 sm:$0xff]  }
  0x8c   : > { %845 = vmatprep.subr.bf16.mxu1 %v2359_v7  ;;  %v2364_v11 = vld [vmem:[#allocation7 + $0x60] ss:$8 sps:$4 sm:$0xff]   ;;  %v2365_v12 = vld [vmem:[#allocation7 + $0x54] ss:$8 sps:$4 sm:$0xff]   ;;  %v2367_v14 = vld [vmem:[#allocation7 + $0x50] ss:$8 sps:$4 sm:$0xff]  }
  0x8d   : > { %846 = vmatpush1.bf16.msra.mxu1 %v2361_v8  ;;  %v2350_v13 = vld [vmem:[#allocation5] sm:$0xff]   ;;  %v2371_v17 = vld [vmem:[#allocation7 + $0x34] ss:$8 sps:$4 sm:$0xff]   ;;  %v2352_v18 = vld [vmem:[%s2939_s12 + $0x8] sm:$0xff]   ;;  %s1812_s5 = scalar_lea.sflag [#allocation4], %s2935_s9  ;;  %s2613_s23 = scalar_lea.vmem %s3114_s19, 2048 }
  0x8e   : > { %2162 = vmatpush3.bf16.msra.mxu0 %v2344_v1  ;;  %847 = vmatprep.subr.bf16.mxu1 %v2362_v9  ;;  %v2368_v15 = vld [vmem:[#allocation7 + $0x44] ss:$8 sps:$4 sm:$0xff]   ;;  %v2370_v16 = vld [vmem:[#allocation7 + $0x40] ss:$8 sps:$4 sm:$0xff]   ;;  %v2353_v19 = vld [vmem:[%s2939_s12 + $0x10] sm:$0xff]   ;;  %p2614_p10 = scmp.ne.s32.totalorder %s3114_s19, %s2613_s23  ;;  %p3209_p11 = scmp.ne.s32.totalorder %s3198_s13, 0 }
  0x8f   : > { %2163 = vmatprep.subr.bf16.mxu0 %v2345_v2  ;;  %v2373_v20 = vld [vmem:[#allocation7 + $0x30] ss:$8 sps:$4 sm:$0xff]   ;;  %v2355_v22 = vld [vmem:[%s2939_s12 + $0x20] sm:$0xff]   ;;  %v2356_v23 = vld [vmem:[%s2939_s12 + $0x28] sm:$0xff]   ;;  %s2702_s7 = smov [#allocation13]  }
  0x90   : > { %v2354_v21 = vld [vmem:[%s2939_s12 + $0x18] sm:$0xff]   ;;  %v2357_v24 = vld [vmem:[%s2939_s12 + $0x30] sm:$0xff]   ;;  %v2374_v26 = vld [vmem:[#allocation7 + $0x24] ss:$8 sps:$4 sm:$0xff]   ;;  %p2615_p0 = pnand %p2614_p10, %p3209_p11  ;;  %s2617_s24 = sshll.u32 %s2702_s7, 4  ;;  %s2618_s24 = int_to_ptr.vmem [resolvable:$false] %s2617_s24 }
  0x91   : > { %848 = vmatpush1.bf16.msra.mxu1 %v2364_v11  ;;  %v2358_v25 = vld [vmem:[%s2939_s12 + $0x38] sm:$0xff]   ;;  %v2376_v27 = vld [vmem:[#allocation7 + $0x20] ss:$8 sps:$4 sm:$0xff]   ;;  %v2380_v30 = vld [vmem:[#allocation7 + $0x4] ss:$8 sps:$4 sm:$0xff]   ;;  %s2619_s15 = scalar_lea.vmem %s2618_s24, 4096  ;;  %p2620_p5 = scmp.lt.s32.totalorder %s3114_s19, %s2618_s24 }
  0x92   : > { %2164 = vmatpush3.bf16.msra.mxu0 %v2345_v2  ;;  %849 = vmatprep.subr.bf16.mxu1 %v2365_v12  ;;  %v2377_v28 = vld [vmem:[#allocation7 + $0x14] ss:$8 sps:$4 sm:$0xff]   ;;  %v2379_v29 = vld [vmem:[#allocation7 + $0x10] ss:$8 sps:$4 sm:$0xff]   ;;  %v2382_v31 = vld [vmem:[#allocation7] ss:$8 sps:$4 sm:$0xff]   ;;  %p2616_p13 = pneg %p2615_p0  ;;  %p2621_p9 = scmp.lt.s32.totalorder %s2619_s15, %s2613_s23 }
  0x93   : > { %2165 = vmatprep.subr.bf16.mxu0 %v2346_v3  ;;  %v2383_v33 = vld [vmem:[#allocation8 + $0x70] ss:$8 sps:$4 sm:$0xff]   ;;  %v2385_v34 = vld [vmem:[#allocation8 + $0x74] ss:$8 sps:$4 sm:$0xff]   ;;  %v2388_v35 = vld [vmem:[#allocation8 + $0x64] ss:$8 sps:$4 sm:$0xff]  }
  0x94   : > { %v2386_v36 = vld [vmem:[#allocation8 + $0x60] ss:$8 sps:$4 sm:$0xff]   ;;  %v2391_v37 = vld [vmem:[#allocation8 + $0x54] ss:$8 sps:$4 sm:$0xff]   ;;  %v2389_v38 = vld [vmem:[#allocation8 + $0x50] ss:$8 sps:$4 sm:$0xff]   ;;  %p2622_p1 = por %p2621_p9, %p2620_p5 }
  0x95   : > { %850 = vmatpush1.bf16.msra.mxu1 %v2367_v14  ;;  %v2394_v39 = vld [vmem:[#allocation8 + $0x44] ss:$8 sps:$4 sm:$0xff]   ;;  %v2392_v40 = vld [vmem:[#allocation8 + $0x40] ss:$8 sps:$4 sm:$0xff]   ;;  %v2397_v41 = vld [vmem:[#allocation8 + $0x34] ss:$8 sps:$4 sm:$0xff]  }
  0x96   : > { %2166 = vmatpush3.bf16.msra.mxu0 %v2346_v3  ;;  %851 = vmatprep.subr.bf16.mxu1 %v2368_v15  ;;  %v2395_v42 = vld [vmem:[#allocation8 + $0x30] ss:$8 sps:$4 sm:$0xff]   ;;  %v2400_v43 = vld [vmem:[#allocation8 + $0x24] ss:$8 sps:$4 sm:$0xff]   ;;  %v2398_v44 = vld [vmem:[#allocation8 + $0x20] ss:$8 sps:$4 sm:$0xff]   ;;  %p2623_p3 = pnand %p2622_p1, %p2616_p13 }
  0x97   : > { %2167 = vmatprep.subr.bf16.mxu0 %v2347_v5  ;;  %v2403_v45 = vld [vmem:[#allocation8 + $0x14] ss:$8 sps:$4 sm:$0xff]   ;;  %v2401_v46 = vld [vmem:[#allocation8 + $0x10] ss:$8 sps:$4 sm:$0xff]   ;;  %v2406_v47 = vld [vmem:[#allocation8 + $0x4] ss:$8 sps:$4 sm:$0xff]  }
  0x98   : > { %v2404_v48 = vld [vmem:[#allocation8] ss:$8 sps:$4 sm:$0xff]   ;;  %v2409_v49 = vld [vmem:[#allocation8 + $0xf4] ss:$8 sps:$4 sm:$0xff]   ;;  %v2407_v50 = vld [vmem:[#allocation8 + $0xf0] ss:$8 sps:$4 sm:$0xff]  }
  0x99   : > { %852 = vmatpush1.bf16.msra.mxu1 %v2370_v16  ;;  %v2412_v51 = vld [vmem:[#allocation8 + $0xe4] ss:$8 sps:$4 sm:$0xff]   ;;  %v2410_v52 = vld [vmem:[#allocation8 + $0xe0] ss:$8 sps:$4 sm:$0xff]   ;;  %v2415_v53 = vld [vmem:[#allocation8 + $0xd4] ss:$8 sps:$4 sm:$0xff]  }
  0x9a   : > { %2168 = vmatpush3.bf16.msra.mxu0 %v2347_v5  ;;  %853 = vmatprep.subr.bf16.mxu1 %v2371_v17  ;;  %v2413_v54 = vld [vmem:[#allocation8 + $0xd0] ss:$8 sps:$4 sm:$0xff]   ;;  %v2418_v55 = vld [vmem:[#allocation8 + $0xc4] ss:$8 sps:$4 sm:$0xff]   ;;  %v2416_v56 = vld [vmem:[#allocation8 + $0xc0] ss:$8 sps:$4 sm:$0xff]  }
  0x9b   : > { %2169 = vmatprep.subr.bf16.mxu0 %v2348_v6  ;;  %v2421_v57 = vld [vmem:[#allocation8 + $0xb4] ss:$8 sps:$4 sm:$0xff]   ;;  %v2419_v58 = vld [vmem:[#allocation8 + $0xb0] ss:$8 sps:$4 sm:$0xff]   ;;  %v1965_v61 = vld [vmem:[%s3161_s2] ss:$0 sm:$0xff] }
  0x9d   : > { %854 = vmatpush1.bf16.msra.mxu1 %v2373_v20 }
  0x9e   : > { %2170 = vmatpush3.bf16.msra.mxu0 %v2348_v6  ;;  %855 = vmatprep.subr.bf16.mxu1 %v2374_v26 }
  0x9f   : > { %2171 = vmatprep.subr.bf16.mxu0 %v2349_v10 }
  0xa1   : > { %856 = vmatpush1.bf16.msra.mxu1 %v2376_v27 }
  0xa2   : > { %2172 = vmatpush3.bf16.msra.mxu0 %v2349_v10  ;;  %857 = vmatprep.subr.bf16.mxu1 %v2377_v28 }
  0xa3   : > { %2173 = vmatprep.subr.bf16.mxu0 %v2350_v13 }
  0xa5   : > { %858 = vmatpush1.bf16.msra.mxu1 %v2379_v29 }
  0xa6   : > { %2174 = vmatpush3.bf16.msra.mxu0 %v2350_v13  ;;  %859 = vmatprep.subr.bf16.mxu1 %v2380_v30 }
  0xa7   : > { %1210 = vmatprep.subr.bf16.mxu0 %v2385_v34 }
  0xa9   : > { %2176 = vmatmul.mubr.bf16.vlgmr.msra.gmra.mxu0 %v2352_v18  ;;  %860 = vmatpush1.bf16.msra.mxu1 %v2382_v31 }
  0xaa   : > { %2179 = vmatprep.mubr.bf16.mxu0 %v2353_v19  ;;  %1211 = vmatpush1.bf16.msra.mxu0 %v2383_v33 }
  0xab   : > { %1212 = vmatprep.subr.bf16.mxu0 %v2388_v35 }
  0xae   : > { %1213 = vmatpush1.bf16.msra.mxu0 %v2386_v36 }
  0xaf   : > { %1214 = vmatprep.subr.bf16.mxu0 %v2391_v37 }
  0xb1   : > { %2180 = vmatmul.mubr.bf16.gmra.mxu0 %v2354_v21 }
  0xb2   : > { %2183 = vmatprep.mubr.bf16.mxu0 %v2355_v22  ;;  %1215 = vmatpush1.bf16.msra.mxu0 %v2389_v38 }
  0xb3   : > { %1216 = vmatprep.subr.bf16.mxu0 %v2394_v39 }
  0xb6   : > { %1217 = vmatpush1.bf16.msra.mxu0 %v2392_v40 }
  0xb7   : > { %1218 = vmatprep.subr.bf16.mxu0 %v2397_v41 }
  0xb9   : > { %2184 = vmatmul.mubr.bf16.gmra.mxu0 %v2356_v23 }
  0xba   : > { %2187 = vmatprep.mubr.bf16.mxu0 %v2357_v24  ;;  %1219 = vmatpush1.bf16.msra.mxu0 %v2395_v42 }
  0xbb   : > { %1220 = vmatprep.subr.bf16.mxu0 %v2400_v43 }
  0xbe   : > { %1221 = vmatpush1.bf16.msra.mxu0 %v2398_v44 }
  0xbf   : > { %1222 = vmatprep.subr.bf16.mxu0 %v2403_v45 }
  0xc1   : > { %2188 = vmatmul.mubr.bf16.gmra.mxu0 %v2358_v25 }
  0xc2   : > { %1223 = vmatpush1.bf16.msra.mxu0 %v2401_v46 }
  0xc3   : > { %1224 = vmatprep.subr.bf16.mxu0 %v2406_v47 }
  0xc6   : > { %1225 = vmatpush1.bf16.msra.mxu0 %v2404_v48 }
  0xc7   : > { %1226 = vmatprep.subr.bf16.mxu0 %v2409_v49 }
  0xca   : > { %1227 = vmatpush2.bf16.msra.mxu0 %v2407_v50 }
  0xcb   : > { %1228 = vmatprep.subr.bf16.mxu0 %v2412_v51 }
  0xce   : > { %1229 = vmatpush2.bf16.msra.mxu0 %v2410_v52 }
  0xcf   : > { %1230 = vmatprep.subr.bf16.mxu0 %v2415_v53  ;;  %v2424_v53 = vld [vmem:[#allocation8 + $0xa4] ss:$8 sps:$4 sm:$0xff]  }
  0xd2   : > { %1231 = vmatpush2.bf16.msra.mxu0 %v2413_v54  ;;  %v2422_v54 = vld [vmem:[#allocation8 + $0xa0] ss:$8 sps:$4 sm:$0xff]  }
  0xd3   : > { %1232 = vmatprep.subr.bf16.mxu0 %v2418_v55  ;;  %v2427_v55 = vld [vmem:[#allocation8 + $0x94] ss:$8 sps:$4 sm:$0xff]  }
  0xd6   : > { %1233 = vmatpush2.bf16.msra.mxu0 %v2416_v56  ;;  %v2425_v56 = vld [vmem:[#allocation8 + $0x90] ss:$8 sps:$4 sm:$0xff]  }
  0xd7   : > { %1234 = vmatprep.subr.bf16.mxu0 %v2421_v57  ;;  %v2430_v57 = vld [vmem:[#allocation8 + $0x84] ss:$8 sps:$4 sm:$0xff]  }
  0xda   : > { %1235 = vmatpush2.bf16.msra.mxu0 %v2419_v58  ;;  %v2428_v58 = vld [vmem:[#allocation8 + $0x80] ss:$8 sps:$4 sm:$0xff]  }
  0xdb   : > { %1236 = vmatprep.subr.bf16.mxu0 %v2424_v53 }
  0xde   : > { %1237 = vmatpush2.bf16.msra.mxu0 %v2422_v54 }
  0xdf   : > { %1238 = vmatprep.subr.bf16.mxu0 %v2427_v55 }
  0xe2   : > { %1239 = vmatpush2.bf16.msra.mxu0 %v2425_v56 }
  0xe3   : > { %1240 = vmatprep.subr.bf16.mxu0 %v2430_v57 }
  0xe6   : > { %1241 = vmatpush2.bf16.msra.mxu0 %v2428_v58 }
 0x169   : > { %v2177_v59 = vpop.f32.mrf.mxu0 }
 0x16a   : > { %v659_v9 = vadd.f32 %v2177_v59, %v1965_v61  ;;  %v2431_v59 = vld [vmem:[#allocation10 + $0x78] sm:$0xff]  }
 0x16b   : > { %v650_v60 = vpop.f32.mrf.mxu0  ;;  %2079 = vmatprep.subr.bf16.mxu1 %v2431_v59 }
 0x16c   : > { %v651_v63 = vadd.f32 %v1965_v61, %v650_v60  ;;  %v715_v12 = vmax.f32 %v659_v9, 0.0  ;;  %v2432_v60 = vld [vmem:[#allocation10 + $0x38] sm:$0xff]  }
 0x16d   : > { %v2178_v62 = vpop.f32.mrf.mxu0 }
 0x16e   : > { %v713_v3 = vmax.f32 %v651_v63, 0.0  ;;  %v662_v6 = vadd.f32 %v2178_v62, %v1965_v61  ;;  %v2435_v62 = vld [vmem:[#allocation10 + $0x68] sm:$0xff]  }
 0x16f   : > { %v653_v0 = vpop.f32.mrf.mxu0  ;;  %v2436_v63 = vld [vmem:[#allocation10 + $0x28] sm:$0xff]  }
 0x170   : > { %v654_v1 = vadd.f32 %v1965_v61, %v653_v0  ;;  %v716_v10 = vmax.f32 %v662_v6, 0.0  ;;  %v2437_v0 = vld [vmem:[#allocation10 + $0x60] sm:$0xff]   ;;  %v2443_v6 = vld [vmem:[#allocation10 + $0x48] sm:$0xff]  }
 0x171   : > { %v2181_v2 = vpop.f32.mrf.mxu0 }
 0x172   : > { %v714_v4 = vmax.f32 %v654_v1, 0.0  ;;  %v730_v13 = vpack.c.bf16 %v716_v10, %v715_v12  ;;  %v675_v20 = vadd.f32 %v2181_v2, %v1965_v61  ;;  %v2438_v1 = vld [vmem:[#allocation10 + $0x20] sm:$0xff]   ;;  %v2439_v2 = vld [vmem:[#allocation10 + $0x58] sm:$0xff]  }
 0x173   : > { %v666_v5 = vpop.f32.mrf.mxu0  ;;  %v753_v12 = vld [vmem:[%s3163_s4] sm:$0x3] }
 0x174   : > { %v729_v7 = vpack.c.bf16 %v714_v4, %v713_v3  ;;  %v667_v14 = vadd.f32 %v1965_v61, %v666_v5  ;;  %v719_v24 = vmax.f32 %v675_v20, 0.0  ;;  %v2440_v3 = vld [vmem:[#allocation10 + $0x18] sm:$0xff]   ;;  %v2441_v4 = vld [vmem:[#allocation10 + $0x50] sm:$0xff]  }
 0x175   : > { %v2182_v8 = vpop.f32.mrf.mxu0  ;;  %v2442_v5 = vld [vmem:[#allocation10 + $0x10] sm:$0xff]  }
 0x176   : > { %878 = vmatmul.mubr.bf16.vlgmr.msra.gmra.mxu1 %v729_v7  ;;  %v717_v17 = vmax.f32 %v667_v14, 0.0  ;;  %v678_v21 = vadd.f32 %v2182_v8, %v1965_v61  ;;  %v2444_v7 = vld [vmem:[#allocation10 + $0x8] sm:$0xff]   ;;  %v755_v8 = vlaneseq }
 0x177   : > { %887 = vmatprep.mubr.bf16.mxu1 %v2701_v32  ;;  %v669_v11 = vpop.f32.mrf.mxu0  ;;  %2080 = vmatpush3.bf16.msra.mxu1 %v2432_v60 }
 0x178   : > { %v670_v15 = vadd.f32 %v1965_v61, %v669_v11  ;;  %v720_v25 = vmax.f32 %v678_v21, 0.0  ;;  %v2976_v9 = vshrl.u32 %v755_v8, 7 }
 0x179   : > { %v2185_v16 = vpop.f32.mrf.mxu0 }
 0x17a   : > { %v718_v18 = vmax.f32 %v670_v15, 0.0  ;;  %v732_v27 = vpack.c.bf16 %v720_v25, %v719_v24  ;;  %v691_v35 = vadd.f32 %v2185_v16, %v1965_v61  ;;  %v761_v10 = vsub.s32 1, %v2976_v9 }
 0x17b   : > { %v682_v19 = vpop.f32.mrf.mxu0  ;;  %v757_v11 = vsub.s32 0, %v2976_v9 }
 0x17c   : > { %v731_v22 = vpack.c.bf16 %v718_v18, %v717_v17  ;;  %v683_v28 = vadd.f32 %v1965_v61, %v682_v19  ;;  %v723_v39 = vmax.f32 %v691_v35, 0.0  ;;  %v2985_v14 = vrot.slane %v753_v12, %v761_v10 }
 0x17d   : > { %v2186_v23 = vpop.f32.mrf.mxu0  ;;  %v2989_v15 = vrot.slane %v753_v12, %v757_v11 }
 0x17e   : > { %888 = vmatmul.mubr.bf16.gmra.mxu1 %v730_v13  ;;  %v721_v31 = vmax.f32 %v683_v28, 0.0  ;;  %v694_v36 = vadd.f32 %v2186_v23, %v1965_v61 }
 0x17f   : > { %897 = vmatprep.mubr.bf16.mxu1 %v2701_v32  ;;  %v685_v26 = vpop.f32.mrf.mxu0 }
 0x180   : > { %v686_v29 = vadd.f32 %v1965_v61, %v685_v26  ;;  %v724_v40 = vmax.f32 %v694_v36, 0.0 }
 0x181   : > { %v2189_v30 = vpop.f32.mrf.mxu0 }
 0x182   : > { %v722_v33 = vmax.f32 %v686_v29, 0.0  ;;  %v734_v42 = vpack.c.bf16 %v724_v40, %v723_v39  ;;  %v707_v47 = vadd.f32 %v2189_v30, %v1965_v61 }
 0x183   : > { %v698_v34 = vpop.f32.mrf.mxu0 }
 0x184   : > { %v733_v37 = vpack.c.bf16 %v722_v33, %v721_v31  ;;  %v699_v43 = vadd.f32 %v1965_v61, %v698_v34  ;;  %v727_v50 = vmax.f32 %v707_v47, 0.0 }
 0x185   : > { %v2190_v38 = vpop.f32.mrf.mxu0 }
 0x186   : > { %898 = vmatmul.mubr.bf16.gmra.mxu1 %v731_v22  ;;  %v725_v45 = vmax.f32 %v699_v43, 0.0  ;;  %v710_v48 = vadd.f32 %v2190_v38, %v1965_v61 }
 0x187   : > { %907 = vmatprep.mubr.bf16.mxu1 %v2701_v32  ;;  %v701_v41 = vpop.f32.mrf.mxu0 }
 0x188   : > { %v702_v44 = vadd.f32 %v1965_v61, %v701_v41  ;;  %v728_v51 = vmax.f32 %v710_v48, 0.0  ;;  %v2433_v61 = vld [vmem:[#allocation10 + $0x70] sm:$0xff]  }
 0x189   : > { %2081 = vmatprep.subr.bf16.mxu1 %v2433_v61 }
 0x18a   : > { %v726_v46 = vmax.f32 %v702_v44, 0.0  ;;  %v736_v52 = vpack.c.bf16 %v728_v51, %v727_v50 }
 0x18c   : > { %v735_v49 = vpack.c.bf16 %v726_v46, %v725_v45 }
 0x18e   : > { %908 = vmatmul.mubr.bf16.gmra.mxu1 %v732_v27 }
 0x18f   : > { %917 = vmatprep.mubr.bf16.mxu1 %v2701_v32 }
 0x196   : > { %918 = vmatmul.mubr.bf16.gmra.mxu1 %v733_v37 }
 0x197   : > { %927 = vmatprep.mubr.bf16.mxu1 %v2701_v32 }
 0x19e   : > { %928 = vmatmul.mubr.bf16.gmra.mxu1 %v734_v42 }
 0x19f   : > { %937 = vmatprep.mubr.bf16.mxu1 %v2701_v32 }
 0x1a6   : > { %938 = vmatmul.mubr.bf16.gmra.mxu1 %v735_v49 }
 0x1a7   : > { %947 = vmatprep.mubr.bf16.mxu1 %v2701_v32  ;;  %v2434_v32 = vld [vmem:[#allocation10 + $0x30] sm:$0xff]  }
 0x1a8   : > { %2082 = vmatpush3.bf16.msra.mxu1 %v2434_v32 }
 0x1a9   : > { %2083 = vmatprep.subr.bf16.mxu1 %v2435_v62 }
 0x1ac   : > { %2084 = vmatpush3.bf16.msra.mxu1 %v2436_v63 }
 0x1ad   : > { %2085 = vmatprep.subr.bf16.mxu1 %v2437_v0 }
 0x1ae   : > { %948 = vmatmul.mubr.bf16.gmra.mxu1 %v736_v52 }
 0x1b0   : > { %2086 = vmatpush3.bf16.msra.mxu1 %v2438_v1 }
 0x1b1   : > { %2087 = vmatprep.subr.bf16.mxu1 %v2439_v2 }
 0x1b4   : > { %2088 = vmatpush3.bf16.msra.mxu1 %v2440_v3 }
 0x1b5   : > { %2089 = vmatprep.subr.bf16.mxu1 %v2441_v4 }
 0x1b8   : > { %2090 = vmatpush3.bf16.msra.mxu1 %v2442_v5 }
 0x1b9   : > { %2091 = vmatprep.subr.bf16.mxu1 %v2443_v6 }
 0x1bc   : > { %2092 = vmatpush3.bf16.msra.mxu1 %v2444_v7 }
 0x236   : > { %v879_v13 = vpop.f32.mrf.mxu1 }
 0x237   : > { %v880_v20 = vadd.f32 %v879_v13, %v2989_v15 }
 0x238   : > { %v881_v16 = vpop.f32.mrf.mxu1 }
 0x239   : > { %v882_v18 = vadd.f32 %v881_v16, %v2985_v14  ;;  %v958_v27 = vmax.f32 %v880_v20, 0.0 }
 0x23a   : > { %v883_v17 = vpop.f32.mrf.mxu1 }
 0x23b   : > { %v884_v19 = vadd.f32 %v883_v17, %v2989_v15  ;;  %v959_v25 = vmax.f32 %v882_v18, 0.0 }
 0x23c   : > { %v885_v21 = vpop.f32.mrf.mxu1 }
 0x23d   : > { %v886_v22 = vadd.f32 %v885_v21, %v2985_v14  ;;  %v960_v23 = vmax.f32 %v884_v19, 0.0 }
 0x23e   : > { %v889_v24 = vpop.f32.mrf.mxu1 }
 0x23f   : > { %v961_v26 = vmax.f32 %v886_v22, 0.0  ;;  %v990_v30 = vpack.c.bf16 %v960_v23, %v958_v27  ;;  %v890_v35 = vadd.f32 %v889_v24, %v2989_v15 }
 0x240   : > { %v891_v28 = vpop.f32.mrf.mxu1 }
 0x241   : > { %v991_v29 = vpack.c.bf16 %v961_v26, %v959_v25  ;;  %v892_v33 = vadd.f32 %v891_v28, %v2985_v14  ;;  %v962_v42 = vmax.f32 %v890_v35, 0.0 }
 0x242   : > { %v893_v31 = vpop.f32.mrf.mxu1 }
 0x243   : > { %v894_v34 = vadd.f32 %v893_v31, %v2989_v15  ;;  %1242 = vmatprep.mubr.bf16.mxu0 %v991_v29  ;;  %v963_v40 = vmax.f32 %v892_v33, 0.0 }
 0x244   : > { %v895_v36 = vpop.f32.mrf.mxu1  ;;  %1243 = vmatmul.mubr.bf16.vlgmr.msra.gmra.mxu0 %v990_v30 }
 0x245   : > { %v896_v37 = vadd.f32 %v895_v36, %v2985_v14  ;;  %v964_v38 = vmax.f32 %v894_v34, 0.0 }
 0x246   : > { %v899_v39 = vpop.f32.mrf.mxu1 }
 0x247   : > { %v965_v41 = vmax.f32 %v896_v37, 0.0  ;;  %v992_v45 = vpack.c.bf16 %v964_v38, %v962_v42  ;;  %v900_v49 = vadd.f32 %v899_v39, %v2989_v15 }
 0x248   : > { %v901_v43 = vpop.f32.mrf.mxu1 }
 0x249   : > { %v993_v44 = vpack.c.bf16 %v965_v41, %v963_v40  ;;  %v902_v47 = vadd.f32 %v901_v43, %v2985_v14  ;;  %v966_v56 = vmax.f32 %v900_v49, 0.0 }
 0x24a   : > { %v903_v46 = vpop.f32.mrf.mxu1 }
 0x24b   : > { %v904_v48 = vadd.f32 %v903_v46, %v2989_v15  ;;  %1252 = vmatprep.mubr.bf16.mxu0 %v993_v44  ;;  %v967_v54 = vmax.f32 %v902_v47, 0.0 }
 0x24c   : > { %v905_v50 = vpop.f32.mrf.mxu1  ;;  %1253 = vmatmul.mubr.bf16.gmra.mxu0 %v992_v45 }
 0x24d   : > { %v906_v51 = vadd.f32 %v905_v50, %v2985_v14  ;;  %v968_v52 = vmax.f32 %v904_v48, 0.0 }
 0x24e   : > { %v909_v53 = vpop.f32.mrf.mxu1 }
 0x24f   : > { %v969_v55 = vmax.f32 %v906_v51, 0.0  ;;  %v994_v59 = vpack.c.bf16 %v968_v52, %v966_v56  ;;  %v910_v62 = vadd.f32 %v909_v53, %v2989_v15 }
 0x250   : > { %v911_v57 = vpop.f32.mrf.mxu1 }
 0x251   : > { %v995_v58 = vpack.c.bf16 %v969_v55, %v967_v54  ;;  %v912_v61 = vadd.f32 %v911_v57, %v2985_v14  ;;  %v970_v5 = vmax.f32 %v910_v62, 0.0 }
 0x252   : > { %v913_v60 = vpop.f32.mrf.mxu1 }
 0x253   : > { %v914_v32 = vadd.f32 %v913_v60, %v2989_v15  ;;  %1262 = vmatprep.mubr.bf16.mxu0 %v995_v58  ;;  %v971_v3 = vmax.f32 %v912_v61, 0.0 }
 0x254   : > { %v915_v63 = vpop.f32.mrf.mxu1  ;;  %1263 = vmatmul.mubr.bf16.gmra.mxu0 %v994_v59 }
 0x255   : > { %v916_v0 = vadd.f32 %v915_v63, %v2985_v14  ;;  %v972_v1 = vmax.f32 %v914_v32, 0.0 }
 0x256   : > { %v919_v2 = vpop.f32.mrf.mxu1 }
 0x257   : > { %v973_v4 = vmax.f32 %v916_v0, 0.0  ;;  %v996_v8 = vpack.c.bf16 %v972_v1, %v970_v5  ;;  %v920_v17 = vadd.f32 %v919_v2, %v2989_v15  ;;  %v2446_v5 = vld [vmem:[#allocation10] sm:$0xff]  }
 0x258   : > { %v921_v6 = vpop.f32.mrf.mxu1 }
 0x259   : > { %v997_v7 = vpack.c.bf16 %v973_v4, %v971_v3  ;;  %v922_v13 = vadd.f32 %v921_v6, %v2985_v14  ;;  %v974_v24 = vmax.f32 %v920_v17, 0.0  ;;  %v2445_v4 = vld [vmem:[#allocation10 + $0x40] sm:$0xff]   ;;  %v2447_v6 = vld [vmem:[#allocation11 + $0x38] sm:$0xff]  }
 0x25a   : > { %v923_v12 = vpop.f32.mrf.mxu1  ;;  %2093 = vmatprep.subr.bf16.mxu1 %v2445_v4  ;;  %2191 = vmatprep.subr.bf16.mxu0 %v2447_v6 }
 0x25b   : > { %v924_v16 = vadd.f32 %v923_v12, %v2989_v15  ;;  %1272 = vmatprep.mubr.bf16.mxu0 %v997_v7  ;;  %v975_v22 = vmax.f32 %v922_v13, 0.0  ;;  %2094 = vmatpush3.bf16.msra.mxu1 %v2446_v5  ;;  %v2448_v7 = vld [vmem:[#allocation11 + $0x30] sm:$0xff]  }
 0x25c   : > { %v925_v18 = vpop.f32.mrf.mxu1  ;;  %1273 = vmatmul.mubr.bf16.gmra.mxu0 %v996_v8  ;;  %2223 = vmatprep.subr.bf16.mxu1 %v2447_v6 }
 0x25d   : > { %v926_v19 = vadd.f32 %v925_v18, %v2985_v14  ;;  %v976_v20 = vmax.f32 %v924_v16, 0.0  ;;  %2192 = vmatpush3.bf16.msra.mxu0 %v2447_v6 }
 0x25e   : > { %v929_v21 = vpop.f32.mrf.mxu1  ;;  %2193 = vmatprep.subr.bf16.mxu0 %v2448_v7 }
 0x25f   : > { %v977_v23 = vmax.f32 %v926_v19, 0.0  ;;  %v998_v27 = vpack.c.bf16 %v976_v20, %v974_v24  ;;  %v930_v31 = vadd.f32 %v929_v21, %v2989_v15 }
 0x260   : > { %v931_v25 = vpop.f32.mrf.mxu1 }
 0x261   : > { %v999_v26 = vpack.c.bf16 %v977_v23, %v975_v22  ;;  %v932_v29 = vadd.f32 %v931_v25, %v2985_v14  ;;  %v978_v39 = vmax.f32 %v930_v31, 0.0  ;;  %2194 = vmatpush3.bf16.msra.mxu0 %v2448_v7 }
 0x262   : > { %v933_v28 = vpop.f32.mrf.mxu1 }
 0x263   : > { %v934_v30 = vadd.f32 %v933_v28, %v2989_v15  ;;  %1282 = vmatprep.mubr.bf16.mxu0 %v999_v26  ;;  %v979_v37 = vmax.f32 %v932_v29, 0.0 }
 0x264   : > { %v935_v33 = vpop.f32.mrf.mxu1  ;;  %1283 = vmatmul.mubr.bf16.gmra.mxu0 %v998_v27 }
 0x265   : > { %v936_v34 = vadd.f32 %v935_v33, %v2985_v14  ;;  %v980_v35 = vmax.f32 %v934_v30, 0.0 }
 0x266   : > { %v939_v36 = vpop.f32.mrf.mxu1 }
 0x267   : > { %v981_v38 = vmax.f32 %v936_v34, 0.0  ;;  %v1000_v42 = vpack.c.bf16 %v980_v35, %v978_v39  ;;  %v940_v46 = vadd.f32 %v939_v36, %v2989_v15 }
 0x268   : > { %v941_v40 = vpop.f32.mrf.mxu1 }
 0x269   : > { %v1001_v41 = vpack.c.bf16 %v981_v38, %v979_v37  ;;  %v942_v44 = vadd.f32 %v941_v40, %v2985_v14  ;;  %v982_v53 = vmax.f32 %v940_v46, 0.0 }
 0x26a   : > { %v943_v43 = vpop.f32.mrf.mxu1 }
 0x26b   : > { %v944_v45 = vadd.f32 %v943_v43, %v2989_v15  ;;  %1292 = vmatprep.mubr.bf16.mxu0 %v1001_v41  ;;  %v983_v51 = vmax.f32 %v942_v44, 0.0 }
 0x26c   : > { %v945_v47 = vpop.f32.mrf.mxu1  ;;  %1293 = vmatmul.mubr.bf16.gmra.mxu0 %v1000_v42 }
 0x26d   : > { %v946_v48 = vadd.f32 %v945_v47, %v2985_v14  ;;  %v984_v49 = vmax.f32 %v944_v45, 0.0 }
 0x26e   : > { %v949_v50 = vpop.f32.mrf.mxu1 }
 0x26f   : > { %v985_v52 = vmax.f32 %v946_v48, 0.0  ;;  %v1002_v56 = vpack.c.bf16 %v984_v49, %v982_v53  ;;  %v950_v60 = vadd.f32 %v949_v50, %v2989_v15 }
 0x270   : > { %v951_v54 = vpop.f32.mrf.mxu1 }
 0x271   : > { %v1003_v55 = vpack.c.bf16 %v985_v52, %v983_v51  ;;  %v952_v58 = vadd.f32 %v951_v54, %v2985_v14  ;;  %v986_v1 = vmax.f32 %v950_v60, 0.0 }
 0x272   : > { %v953_v57 = vpop.f32.mrf.mxu1 }
 0x273   : > { %v954_v59 = vadd.f32 %v953_v57, %v2989_v15  ;;  %1302 = vmatprep.mubr.bf16.mxu0 %v1003_v55  ;;  %v987_v63 = vmax.f32 %v952_v58, 0.0  ;;  %v2449_v15 = vld [vmem:[#allocation11 + $0x28] sm:$0xff]  }
 0x274   : > { %v955_v61 = vpop.f32.mrf.mxu1  ;;  %1303 = vmatmul.mubr.bf16.gmra.mxu0 %v1002_v56  ;;  %2195 = vmatprep.subr.bf16.mxu0 %v2449_v15 }
 0x275   : > { %v956_v32 = vadd.f32 %v955_v61, %v2985_v14  ;;  %v988_v62 = vmax.f32 %v954_v59, 0.0  ;;  %2196 = vmatpush3.bf16.msra.mxu0 %v2449_v15  ;;  %v1038_v14 = vld [vmem:[%s3165_s6] sm:$0x3] }
 0x276   : > { %v3028_v12 = vrot.slane %v1038_v14, %v761_v10  ;;  %v3032_v13 = vrot.slane %v1038_v14, %v757_v11 }
 0x277   : > { %v989_v0 = vmax.f32 %v956_v32, 0.0  ;;  %v1004_v3 = vpack.c.bf16 %v988_v62, %v986_v1 }
 0x279   : > { %v1005_v2 = vpack.c.bf16 %v989_v0, %v987_v63 }
 0x27b   : > { %1312 = vmatprep.mubr.bf16.mxu0 %v1005_v2 }
 0x27c   : > { %1313 = vmatmul.mubr.bf16.gmra.mxu0 %v1004_v3 }
 0x304   : > { %v1244_v8 = vpop.f32.mrf.mxu0 }
 0x305   : > { %v1245_v20 = vadd.f32 %v1244_v8, %v3032_v13 }
 0x306   : > { %v1246_v16 = vpop.f32.mrf.mxu0 }
 0x307   : > { %v1247_v18 = vadd.f32 %v1246_v16, %v3028_v12  ;;  %v1323_v26 = vmax.f32 %v1245_v20, 0.0 }
 0x308   : > { %v1248_v17 = vpop.f32.mrf.mxu0 }
 0x309   : > { %v1249_v19 = vadd.f32 %v1248_v17, %v3032_v13  ;;  %v1324_v25 = vmax.f32 %v1247_v18, 0.0 }
 0x30a   : > { %v1250_v21 = vpop.f32.mrf.mxu0 }
 0x30b   : > { %v1251_v22 = vadd.f32 %v1250_v21, %v3028_v12  ;;  %v1325_v23 = vmax.f32 %v1249_v19, 0.0 }
 0x30c   : > { %v1254_v24 = vpop.f32.mrf.mxu0 }
 0x30d   : > { %v1326_v10 = vmax.f32 %v1251_v22, 0.0  ;;  %v1355_v11 = vpack.c.bf16 %v1325_v23, %v1323_v26  ;;  %v1255_v31 = vadd.f32 %v1254_v24, %v3032_v13 }
 0x30e   : > { %v1256_v27 = vpop.f32.mrf.mxu0 }
 0x30f   : > { %v1356_v9 = vpack.c.bf16 %v1326_v10, %v1324_v25  ;;  %v1257_v29 = vadd.f32 %v1256_v27, %v3028_v12  ;;  %v1327_v39 = vmax.f32 %v1255_v31, 0.0 }
 0x310   : > { %v1258_v28 = vpop.f32.mrf.mxu0 }
 0x311   : > { %v1259_v30 = vadd.f32 %v1258_v28, %v3032_v13  ;;  %1538 = vmatprep.mubr.bf16.mxu1 %v1356_v9  ;;  %v1328_v37 = vmax.f32 %v1257_v29, 0.0 }
 0x312   : > { %v1260_v33 = vpop.f32.mrf.mxu0  ;;  %1539 = vmatmul.mubr.bf16.vlgmr.msra.gmra.mxu1 %v1355_v11 }
 0x313   : > { %v1261_v34 = vadd.f32 %v1260_v33, %v3028_v12  ;;  %2231 = vmatpush3.bf16.msra.mxu1 %v2447_v6  ;;  %v1329_v35 = vmax.f32 %v1259_v30, 0.0 }
 0x314   : > { %v1264_v36 = vpop.f32.mrf.mxu0  ;;  %2224 = vmatprep.subr.bf16.mxu1 %v2448_v7 }
 0x315   : > { %v1330_v38 = vmax.f32 %v1261_v34, 0.0  ;;  %v1357_v42 = vpack.c.bf16 %v1329_v35, %v1327_v39  ;;  %v1265_v46 = vadd.f32 %v1264_v36, %v3032_v13 }
 0x316   : > { %v1266_v40 = vpop.f32.mrf.mxu0 }
 0x317   : > { %v1358_v41 = vpack.c.bf16 %v1330_v38, %v1328_v37  ;;  %2232 = vmatpush3.bf16.msra.mxu1 %v2448_v7  ;;  %v1267_v44 = vadd.f32 %v1266_v40, %v3028_v12  ;;  %v1331_v53 = vmax.f32 %v1265_v46, 0.0 }
 0x318   : > { %v1268_v43 = vpop.f32.mrf.mxu0  ;;  %2225 = vmatprep.subr.bf16.mxu1 %v2449_v15 }
 0x319   : > { %v1269_v45 = vadd.f32 %v1268_v43, %v3032_v13  ;;  %1546 = vmatprep.mubr.bf16.mxu1 %v1358_v41  ;;  %v1332_v51 = vmax.f32 %v1267_v44, 0.0 }
 0x31a   : > { %v1270_v47 = vpop.f32.mrf.mxu0  ;;  %1547 = vmatmul.mubr.bf16.gmra.mxu1 %v1357_v42 }
 0x31b   : > { %v1271_v48 = vadd.f32 %v1270_v47, %v3028_v12  ;;  %2233 = vmatpush3.bf16.msra.mxu1 %v2449_v15  ;;  %v1333_v49 = vmax.f32 %v1269_v45, 0.0 }
 0x31c   : > { %v1274_v50 = vpop.f32.mrf.mxu0 }
 0x31d   : > { %v1334_v52 = vmax.f32 %v1271_v48, 0.0  ;;  %v1359_v56 = vpack.c.bf16 %v1333_v49, %v1331_v53  ;;  %v1275_v60 = vadd.f32 %v1274_v50, %v3032_v13 }
 0x31e   : > { %v1276_v54 = vpop.f32.mrf.mxu0 }
 0x31f   : > { %v1360_v55 = vpack.c.bf16 %v1334_v52, %v1332_v51  ;;  %v1277_v58 = vadd.f32 %v1276_v54, %v3028_v12  ;;  %v1335_v2 = vmax.f32 %v1275_v60, 0.0 }
 0x320   : > { %v1278_v57 = vpop.f32.mrf.mxu0 }
 0x321   : > { %v1279_v59 = vadd.f32 %v1278_v57, %v3032_v13  ;;  %1554 = vmatprep.mubr.bf16.mxu1 %v1360_v55  ;;  %v1336_v0 = vmax.f32 %v1277_v58, 0.0 }
 0x322   : > { %v1280_v61 = vpop.f32.mrf.mxu0  ;;  %1555 = vmatmul.mubr.bf16.gmra.mxu1 %v1359_v56 }
 0x323   : > { %v1281_v32 = vadd.f32 %v1280_v61, %v3028_v12  ;;  %v1337_v62 = vmax.f32 %v1279_v59, 0.0 }
 0x324   : > { %v1284_v63 = vpop.f32.mrf.mxu0 }
 0x325   : > { %v1338_v1 = vmax.f32 %v1281_v32, 0.0  ;;  %v1361_v5 = vpack.c.bf16 %v1337_v62, %v1335_v2  ;;  %v1285_v14 = vadd.f32 %v1284_v63, %v3032_v13  ;;  %v2450_v62 = vld [vmem:[#allocation11 + $0x20] sm:$0xff]   ;;  %v2451_v63 = vld [vmem:[#allocation11 + $0x18] sm:$0xff]  }
 0x326   : > { %v1286_v3 = vpop.f32.mrf.mxu0  ;;  %2197 = vmatprep.subr.bf16.mxu0 %v2450_v62  ;;  %2226 = vmatprep.subr.bf16.mxu1 %v2450_v62 }
 0x327   : > { %v1362_v4 = vpack.c.bf16 %v1338_v1, %v1336_v0  ;;  %v1287_v7 = vadd.f32 %v1286_v3, %v3028_v12  ;;  %v1339_v21 = vmax.f32 %v1285_v14, 0.0  ;;  %2198 = vmatpush3.bf16.msra.mxu0 %v2450_v62  ;;  %2234 = vmatpush3.bf16.msra.mxu1 %v2450_v62  ;;  %v2454_v0 = vld [vmem:[#allocation11] sm:$0xff]  }
 0x328   : > { %v1288_v6 = vpop.f32.mrf.mxu0  ;;  %2199 = vmatprep.subr.bf16.mxu0 %v2451_v63  ;;  %2227 = vmatprep.subr.bf16.mxu1 %v2451_v63 }
 0x329   : > { %v1289_v15 = vadd.f32 %v1288_v6, %v3032_v13  ;;  %1562 = vmatprep.mubr.bf16.mxu1 %v1362_v4  ;;  %v1340_v19 = vmax.f32 %v1287_v7, 0.0  ;;  %v3069_v4 = vld [vmem:[%s3167_s8] ss:$0 sm:$0xff] }
 0x32a   : > { %v1290_v8 = vpop.f32.mrf.mxu0  ;;  %1563 = vmatmul.mubr.bf16.gmra.mxu1 %v1361_v5 }
 0x32b   : > { %v1291_v16 = vadd.f32 %v1290_v8, %v3028_v12  ;;  %v1341_v17 = vmax.f32 %v1289_v15, 0.0  ;;  %2200 = vmatpush3.bf16.msra.mxu0 %v2451_v63  ;;  %2235 = vmatpush3.bf16.msra.mxu1 %v2451_v63 }
 0x32c   : > { %v1294_v18 = vpop.f32.mrf.mxu0 }
 0x32d   : > { %v1342_v20 = vmax.f32 %v1291_v16, 0.0  ;;  %v1363_v24 = vpack.c.bf16 %v1341_v17, %v1339_v21  ;;  %v1295_v27 = vadd.f32 %v1294_v18, %v3032_v13 }
 0x32e   : > { %v1296_v22 = vpop.f32.mrf.mxu0 }
 0x32f   : > { %v1364_v23 = vpack.c.bf16 %v1342_v20, %v1340_v19  ;;  %v1297_v10 = vadd.f32 %v1296_v22, %v3028_v12  ;;  %v1343_v33 = vmax.f32 %v1295_v27, 0.0 }
 0x330   : > { %v1298_v25 = vpop.f32.mrf.mxu0 }
 0x331   : > { %v1299_v26 = vadd.f32 %v1298_v25, %v3032_v13  ;;  %1570 = vmatprep.mubr.bf16.mxu1 %v1364_v23  ;;  %v1344_v30 = vmax.f32 %v1297_v10, 0.0 }
 0x332   : > { %v1300_v9 = vpop.f32.mrf.mxu0  ;;  %1571 = vmatmul.mubr.bf16.gmra.mxu1 %v1363_v24 }
 0x333   : > { %v1301_v11 = vadd.f32 %v1300_v9, %v3028_v12  ;;  %v1345_v28 = vmax.f32 %v1299_v26, 0.0 }
 0x334   : > { %v1304_v29 = vpop.f32.mrf.mxu0 }
 0x335   : > { %v1346_v31 = vmax.f32 %v1301_v11, 0.0  ;;  %v1365_v36 = vpack.c.bf16 %v1345_v28, %v1343_v33  ;;  %v1305_v40 = vadd.f32 %v1304_v29, %v3032_v13 }
 0x336   : > { %v1306_v34 = vpop.f32.mrf.mxu0 }
 0x337   : > { %v1366_v35 = vpack.c.bf16 %v1346_v31, %v1344_v30  ;;  %v1307_v38 = vadd.f32 %v1306_v34, %v3028_v12  ;;  %v1347_v47 = vmax.f32 %v1305_v40, 0.0 }
 0x338   : > { %v1308_v37 = vpop.f32.mrf.mxu0 }
 0x339   : > { %v1309_v39 = vadd.f32 %v1308_v37, %v3032_v13  ;;  %1578 = vmatprep.mubr.bf16.mxu1 %v1366_v35  ;;  %v1348_v45 = vmax.f32 %v1307_v38, 0.0 }
 0x33a   : > { %v1310_v41 = vpop.f32.mrf.mxu0  ;;  %1579 = vmatmul.mubr.bf16.gmra.mxu1 %v1365_v36 }
 0x33b   : > { %v1311_v42 = vadd.f32 %v1310_v41, %v3028_v12  ;;  %v1349_v43 = vmax.f32 %v1309_v39, 0.0 }
 0x33c   : > { %v1314_v44 = vpop.f32.mrf.mxu0 }
 0x33d   : > { %v1350_v46 = vmax.f32 %v1311_v42, 0.0  ;;  %v1367_v50 = vpack.c.bf16 %v1349_v43, %v1347_v47  ;;  %v1315_v54 = vadd.f32 %v1314_v44, %v3032_v13 }
 0x33e   : > { %v1316_v48 = vpop.f32.mrf.mxu0 }
 0x33f   : > { %v1368_v49 = vpack.c.bf16 %v1350_v46, %v1348_v45  ;;  %v1317_v52 = vadd.f32 %v1316_v48, %v3028_v12  ;;  %v1351_v60 = vmax.f32 %v1315_v54, 0.0 }
 0x340   : > { %v1318_v51 = vpop.f32.mrf.mxu0 }
 0x341   : > { %v1319_v53 = vadd.f32 %v1318_v51, %v3032_v13  ;;  %1586 = vmatprep.mubr.bf16.mxu1 %v1368_v49  ;;  %v1352_v58 = vmax.f32 %v1317_v52, 0.0  ;;  %v2452_v13 = vld [vmem:[#allocation11 + $0x10] sm:$0xff]  }
 0x342   : > { %v1320_v55 = vpop.f32.mrf.mxu0  ;;  %1587 = vmatmul.mubr.bf16.gmra.mxu1 %v1367_v50  ;;  %2201 = vmatprep.subr.bf16.mxu0 %v2452_v13 }
 0x343   : > { %v1321_v56 = vadd.f32 %v1320_v55, %v3028_v12  ;;  %v1353_v57 = vmax.f32 %v1319_v53, 0.0  ;;  %2228 = vmatprep.subr.bf16.mxu1 %v2452_v13  ;;  %2202 = vmatpush3.bf16.msra.mxu0 %v2452_v13  ;;  %v2453_v12 = vld [vmem:[#allocation11 + $0x8] sm:$0xff]  }
 0x344   : > { %2236 = vmatpush3.bf16.msra.mxu1 %v2452_v13  ;;  %2203 = vmatprep.subr.bf16.mxu0 %v2453_v12 }
 0x345   : > { %v1354_v59 = vmax.f32 %v1321_v56, 0.0  ;;  %v1369_v32 = vpack.c.bf16 %v1353_v57, %v1351_v60  ;;  %2229 = vmatprep.subr.bf16.mxu1 %v2453_v12 }
 0x347   : > { %v1370_v61 = vpack.c.bf16 %v1354_v59, %v1352_v58  ;;  %2204 = vmatpush3.bf16.msra.mxu0 %v2453_v12 }
 0x348   : > { %2237 = vmatpush3.bf16.msra.mxu1 %v2453_v12  ;;  %2205 = vmatprep.subr.bf16.mxu0 %v2454_v0 }
 0x349   : > { %1594 = vmatprep.mubr.bf16.mxu1 %v1370_v61  ;;  %2230 = vmatprep.subr.bf16.mxu1 %v2454_v0 }
 0x34a   : > { %1595 = vmatmul.mubr.bf16.gmra.mxu1 %v1369_v32 }
 0x34b   : > { %2206 = vmatpush3.bf16.msra.mxu0 %v2454_v0 }
 0x34c   : > { %2238 = vmatpush3.bf16.msra.mxu1 %v2454_v0 }
 0x3d2   : > { %v2095_v1 = vpop.f32.mrf.mxu1 }
 0x3d4   : > { %v2096_v2 = vpop.f32.mrf.mxu1 }
 0x3d5   : > { %v2097_v3 = vadd.f32 %v2096_v2, %v2095_v1 }
 0x3d6   : > { %v2098_v5 = vpop.f32.mrf.mxu1 }
 0x3d7   : > { %v1541_v7 = vadd.f32 %v2097_v3, %v3069_v4 }
 0x3d8   : > { %v2099_v6 = vpop.f32.mrf.mxu1 }
 0x3d9   : > { %v2100_v15 = vadd.f32 %v2099_v6, %v2098_v5  ;;  %v1603_v17 = vmax.f32 %v1541_v7, 0.0 }
 0x3da   : > { %v2101_v14 = vpop.f32.mrf.mxu1 }
 0x3db   : > { %v1544_v8 = vadd.f32 %v2100_v15, %v3069_v4 }
 0x3dc   : > { %v2102_v16 = vpop.f32.mrf.mxu1 }
 0x3dd   : > { %v1604_v18 = vmax.f32 %v1544_v8, 0.0  ;;  %v2103_v19 = vadd.f32 %v2102_v16, %v2101_v14 }
 0x3de   : > { %v2104_v20 = vpop.f32.mrf.mxu1 }
 0x3df   : > { %v1619_v21 = vpack.c.bf16 %v1604_v18, %v1603_v17  ;;  %v1549_v23 = vadd.f32 %v2103_v19, %v3069_v4 }
 0x3e0   : > { %v2105_v22 = vpop.f32.mrf.mxu1 }
 0x3e1   : > { %v2106_v24 = vadd.f32 %v2105_v22, %v2104_v20  ;;  %2207 = vmatprep.mubr.bf16.mxu0 %v1619_v21  ;;  %v1605_v27 = vmax.f32 %v1549_v23, 0.0 }
 0x3e2   : > { %v2107_v25 = vpop.f32.mrf.mxu1 }
 0x3e3   : > { %v1552_v10 = vadd.f32 %v2106_v24, %v3069_v4 }
 0x3e4   : > { %v2108_v26 = vpop.f32.mrf.mxu1 }
 0x3e5   : > { %v1606_v9 = vmax.f32 %v1552_v10, 0.0  ;;  %v2109_v11 = vadd.f32 %v2108_v26, %v2107_v25 }
 0x3e6   : > { %v2110_v28 = vpop.f32.mrf.mxu1 }
 0x3e7   : > { %v1620_v29 = vpack.c.bf16 %v1606_v9, %v1605_v27  ;;  %v1557_v31 = vadd.f32 %v2109_v11, %v3069_v4 }
 0x3e8   : > { %v2111_v30 = vpop.f32.mrf.mxu1 }
 0x3e9   : > { %v2112_v33 = vadd.f32 %v2111_v30, %v2110_v28  ;;  %2208 = vmatmul.mubr.bf16.vlgmr.msra.gmra.mxu0 %v1620_v29  ;;  %v1607_v37 = vmax.f32 %v1557_v31, 0.0  ;;  %v2047_v29 = vld [vmem:[%s3169_s10] ss:$0 sm:$0xff] }
 0x3ea   : > { %v2113_v34 = vpop.f32.mrf.mxu1 }
 0x3eb   : > { %v1560_v35 = vadd.f32 %v2112_v33, %v3069_v4 }
 0x3ec   : > { %v2114_v36 = vpop.f32.mrf.mxu1 }
 0x3ed   : > { %v1608_v38 = vmax.f32 %v1560_v35, 0.0  ;;  %v2115_v39 = vadd.f32 %v2114_v36, %v2113_v34 }
 0x3ee   : > { %v2116_v40 = vpop.f32.mrf.mxu1 }
 0x3ef   : > { %v1621_v41 = vpack.c.bf16 %v1608_v38, %v1607_v37  ;;  %v1565_v43 = vadd.f32 %v2115_v39, %v3069_v4 }
 0x3f0   : > { %v2117_v42 = vpop.f32.mrf.mxu1 }
 0x3f1   : > { %v2118_v44 = vadd.f32 %v2117_v42, %v2116_v40  ;;  %2211 = vmatprep.mubr.bf16.mxu0 %v1621_v41  ;;  %v1609_v48 = vmax.f32 %v1565_v43, 0.0 }
 0x3f2   : > { %v2119_v45 = vpop.f32.mrf.mxu1 }
 0x3f3   : > { %v1568_v46 = vadd.f32 %v2118_v44, %v3069_v4 }
 0x3f4   : > { %v2120_v47 = vpop.f32.mrf.mxu1 }
 0x3f5   : > { %v1610_v49 = vmax.f32 %v1568_v46, 0.0  ;;  %v2121_v50 = vadd.f32 %v2120_v47, %v2119_v45 }
 0x3f6   : > { %v2122_v51 = vpop.f32.mrf.mxu1 }
 0x3f7   : > { %v1622_v52 = vpack.c.bf16 %v1610_v49, %v1609_v48  ;;  %v1573_v54 = vadd.f32 %v2121_v50, %v3069_v4 }
 0x3f8   : > { %v2123_v53 = vpop.f32.mrf.mxu1 }
 0x3f9   : > { %v2124_v55 = vadd.f32 %v2123_v53, %v2122_v51  ;;  %2212 = vmatmul.mubr.bf16.gmra.mxu0 %v1622_v52  ;;  %v1611_v59 = vmax.f32 %v1573_v54, 0.0 }
 0x3fa   : > { %v2125_v56 = vpop.f32.mrf.mxu1 }
 0x3fb   : > { %v1576_v57 = vadd.f32 %v2124_v55, %v3069_v4 }
 0x3fc   : > { %v2126_v58 = vpop.f32.mrf.mxu1 }
 0x3fd   : > { %v1612_v60 = vmax.f32 %v1576_v57, 0.0  ;;  %v2127_v61 = vadd.f32 %v2126_v58, %v2125_v56 }
 0x3fe   : > { %v2128_v32 = vpop.f32.mrf.mxu1 }
 0x3ff   : > { %v1623_v62 = vpack.c.bf16 %v1612_v60, %v1611_v59  ;;  %v1581_v13 = vadd.f32 %v2127_v61, %v3069_v4 }
 0x400   : > { %v2129_v63 = vpop.f32.mrf.mxu1 }
 0x401   : > { %v2130_v12 = vadd.f32 %v2129_v63, %v2128_v32  ;;  %2215 = vmatprep.mubr.bf16.mxu1 %v1623_v62  ;;  %v1613_v3 = vmax.f32 %v1581_v13, 0.0 }
 0x402   : > { %v2131_v0 = vpop.f32.mrf.mxu1 }
 0x403   : > { %v1584_v1 = vadd.f32 %v2130_v12, %v3069_v4 }
 0x404   : > { %v2132_v2 = vpop.f32.mrf.mxu1 }
 0x405   : > { %v1614_v5 = vmax.f32 %v1584_v1, 0.0  ;;  %v2133_v6 = vadd.f32 %v2132_v2, %v2131_v0 }
 0x406   : > { %v2134_v7 = vpop.f32.mrf.mxu1 }
 0x407   : > { %v1624_v15 = vpack.c.bf16 %v1614_v5, %v1613_v3  ;;  %v1589_v8 = vadd.f32 %v2133_v6, %v3069_v4 }
 0x408   : > { %v2135_v14 = vpop.f32.mrf.mxu1 }
 0x409   : > { %v2136_v16 = vadd.f32 %v2135_v14, %v2134_v7  ;;  %2216 = vmatmul.mubr.bf16.vlgmr.msra.gmra.mxu1 %v1624_v15  ;;  %v1615_v20 = vmax.f32 %v1589_v8, 0.0 }
 0x40a   : > { %v2137_v17 = vpop.f32.mrf.mxu1 }
 0x40b   : > { %v1592_v18 = vadd.f32 %v2136_v16, %v3069_v4 }
 0x40c   : > { %v2138_v19 = vpop.f32.mrf.mxu1 }
 0x40d   : > { %v1616_v21 = vmax.f32 %v1592_v18, 0.0  ;;  %v2139_v22 = vadd.f32 %v2138_v19, %v2137_v17 }
 0x40e   : > { %v2140_v23 = vpop.f32.mrf.mxu1 }
 0x40f   : > { %v1625_v24 = vpack.c.bf16 %v1616_v21, %v1615_v20  ;;  %v1597_v10 = vadd.f32 %v2139_v22, %v3069_v4 }
 0x410   : > { %v2141_v25 = vpop.f32.mrf.mxu1 }
 0x411   : > { %v2142_v26 = vadd.f32 %v2141_v25, %v2140_v23  ;;  %2219 = vmatprep.mubr.bf16.mxu1 %v1625_v24  ;;  %v1617_v9 = vmax.f32 %v1597_v10, 0.0 }
 0x413   : > { %v1600_v27 = vadd.f32 %v2142_v26, %v3069_v4 }
 0x415   : > { %v1618_v11 = vmax.f32 %v1600_v27, 0.0 }
 0x417   : > { %v1626_v28 = vpack.c.bf16 %v1618_v11, %v1617_v9 }
 0x419   : > { %2220 = vmatmul.mubr.bf16.gmra.mxu1 %v1626_v28 }
 0x4a9   : > { %v2209_v30 = vpop.f32.mrf.mxu0 }
 0x4aa   : > { %v1741_v31 = vadd.f32 %v2209_v30, %v2047_v29 }
 0x4ab   : > { %v1732_v33 = vpop.f32.mrf.mxu0 }
 0x4ac   : > { %1797 = vst [vmem:[%s3091_s26 + $0x10] sm:$0xff] %v1741_v31  ;;  %v1733_v4 = vadd.f32 %v2047_v29, %v1732_v33 }
 0x4ad   : > { %v2210_v34 = vpop.f32.mrf.mxu0 }
 0x4ae   : > { %1795 = vst [vmem:[%s3091_s26] sm:$0xff] %v1733_v4  ;;  %v1744_v35 = vadd.f32 %v2210_v34, %v2047_v29 }
 0x4af   : > { %v1735_v36 = vpop.f32.mrf.mxu0 }
 0x4b0   : > { %1798 = vst [vmem:[%s3091_s26 + $0x18] sm:$0xff] %v1744_v35  ;;  %v1736_v37 = vadd.f32 %v2047_v29, %v1735_v36 }
 0x4b2   : > { %1796 = vst [vmem:[%s3091_s26 + $0x8] sm:$0xff] %v1736_v37 }
 0x4b9   : > { %v2213_v38 = vpop.f32.mrf.mxu0 }
 0x4ba   : > { %v1757_v39 = vadd.f32 %v2213_v38, %v2047_v29 }
 0x4bb   : > { %v1748_v40 = vpop.f32.mrf.mxu0 }
 0x4bc   : > { %1801 = vst [vmem:[%s3091_s26 + $0x30] sm:$0xff] %v1757_v39  ;;  %v1749_v41 = vadd.f32 %v2047_v29, %v1748_v40 }
 0x4bd   : > { %v2214_v42 = vpop.f32.mrf.mxu0 }
 0x4be   : > { %1799 = vst [vmem:[%s3091_s26 + $0x20] sm:$0xff] %v1749_v41  ;;  %v1760_v43 = vadd.f32 %v2214_v42, %v2047_v29 }
 0x4bf   : > { %v1751_v44 = vpop.f32.mrf.mxu0 }
 0x4c0   : > { %1802 = vst [vmem:[%s3091_s26 + $0x38] sm:$0xff] %v1760_v43  ;;  %v1752_v45 = vadd.f32 %v2047_v29, %v1751_v44 }
 0x4c2   : > { %1800 = vst [vmem:[%s3091_s26 + $0x28] sm:$0xff] %v1752_v45 }
 0x4c9   : > { %v2217_v46 = vpop.f32.mrf.mxu1 }
 0x4ca   : > { %v1773_v47 = vadd.f32 %v2217_v46, %v2047_v29 }
 0x4cb   : > { %v1764_v48 = vpop.f32.mrf.mxu1 }
 0x4cc   : > { %1805 = vst [vmem:[%s3091_s26 + $0x50] sm:$0xff] %v1773_v47  ;;  %v1765_v49 = vadd.f32 %v2047_v29, %v1764_v48 }
 0x4cd   : > { %v2218_v50 = vpop.f32.mrf.mxu1 }
 0x4ce   : > { %1803 = vst [vmem:[%s3091_s26 + $0x40] sm:$0xff] %v1765_v49  ;;  %v1776_v51 = vadd.f32 %v2218_v50, %v2047_v29 }
 0x4cf   : > { %v1767_v52 = vpop.f32.mrf.mxu1 }
 0x4d0   : > { %1806 = vst [vmem:[%s3091_s26 + $0x58] sm:$0xff] %v1776_v51  ;;  %v1768_v53 = vadd.f32 %v2047_v29, %v1767_v52 }
 0x4d2   : > { %1804 = vst [vmem:[%s3091_s26 + $0x48] sm:$0xff] %v1768_v53 }
 0x4d9   : > { %v2221_v54 = vpop.f32.mrf.mxu1 }
 0x4da   : > { %v1789_v55 = vadd.f32 %v2221_v54, %v2047_v29 }
 0x4db   : > { %v1780_v56 = vpop.f32.mrf.mxu1 }
 0x4dc   : > { %1809 = vst [vmem:[%s3091_s26 + $0x70] sm:$0xff] %v1789_v55  ;;  %v1781_v57 = vadd.f32 %v2047_v29, %v1780_v56 }
 0x4dd   : > { %v2222_v58 = vpop.f32.mrf.mxu1 }
 0x4de   : > { %1807 = vst [vmem:[%s3091_s26 + $0x60] sm:$0xff] %v1781_v57  ;;  %v1792_v59 = vadd.f32 %v2222_v58, %v2047_v29 }
 0x4df   : > { %v1783_v60 = vpop.f32.mrf.mxu1 }
 0x4e0   : > { %1810 = vst [vmem:[%s3091_s26 + $0x78] sm:$0xff] %v1792_v59  ;;  %v1784_v61 = vadd.f32 %v2047_v29, %v1783_v60 }
 0x4e2   : > { %1808 = vst [vmem:[%s3091_s26 + $0x68] sm:$0xff] %v1784_v61 }
 0x4e3   : > { %2626 = shalt.err (!%p2623_p3)
}
 0x4e4   : > { %s2627_s16 = scalar_lea.hbm %s3112_s1, 2048  ;;  %s2631_s14 = scalar_lea.hbm %s3170_s11, 4096 }
 0x4e5   : > { %p2628_p4 = scmp.ne.s32.totalorder %s3112_s1, %s2627_s16  ;;  %p2632_p2 = scmp.lt.s32.totalorder %s3112_s1, %s3170_s11 }
 0x4e6   : > { %p2633_p7 = scmp.lt.s32.totalorder %s2631_s14, %s2627_s16 }
 0x4e7   : > { %p2629_p12 = pnand %p2628_p4, %p3209_p11 }
 0x4e8   : > { %p2634_p8 = por %p2633_p7, %p2632_p2 }
 0x4e9   : > { %p2630_p6 = pneg %p2629_p12 }
 0x4eb   : > { %p2635_p10 = pnand %p2634_p8, %p2630_p6 }
 0x4ed   : > { %2638 = shalt.err (!%p2635_p10)
}
 0x4ee   : > { %s2703_s26 = smov 128   ;;  %s2704_s21 = smov 8  }
 0x4ef   : > { %2261 = dma.vmem_to_hbm [thread:$0]  (%p3209_p11), %s3114_s19, 2048, %s3112_s1, %s1812_s5, %s2703_s26, %s2703_s26, %s2704_s21  }
 0x4f0 PF: > { %s1840_s22 = sand.u32 1, %s2677_s17   ;;  %p3210_p0 = scmp.ne.s32.totalorder %s3199_s28, 0 }
 0x4f1   : > { %p3211_p13 = scmp.ge.s32.totalorder %s2689_s20, 2  ;;  %s1841_s12 = scalar_lea.sflag [#allocation4], %s1840_s22 }
 0x4f3   : > { %p2284_p5 = pnand %p3211_p13, %p3210_p0 }
 0x4f5   : > { %p2285_p9 = pneg %p2284_p5 }
 0x4f7   : > { %2672 = dma.done.wait (%p2285_p9), %s1841_s12, 2048  }
 0x4f8   : > { %2674 = vsyncadd (%p2285_p9), %s1841_s12, 4294965248  ;;  %s3212_s23 = sld [smem:[#allocation19_spill]]  ;;  %p27_p1 = scmp.ge.s32.totalorder %s2866_s30, 4  }
 0x4f9   : > { %s3213_s19 = sld [smem:[#allocation20_spill]]  ;;  %s3214_s17 = smov %s2681_s18 }
 0x4fa   : > { %s3216_s20 = smov %s2866_s30  ;;  %29 = sbr.rel (!%p27_p1) target bundleno = 14 (0xe), region = 129 }
 0x4fe   : > { %s3215_s18 = smov %s3212_s23 }
 0x4ff   :  { %1846 = vsyncpa [#allocation3], 1 }
 0x500   :  { %1848 = vsyncpa [#allocation3 + $0x1], 1 }
 0x501   :  { %1849 = vsyncpa [#allocation6], 1 }
 0x502   :  { %1850 = vsyncpa [#allocation9], 1 }
 0x503   :  { %1851 = vsyncpa [#allocation12], 1 }
 0x504   :  { %1852 = vsyncpa [#allocation4], 1 }
 0x505   :  { %1854 = vsyncpa [#allocation4 + $0x1], 1 }

</bundles_post_ra>
